<compile_context>
chip_gen: v7x
topology: tpu7x:2x2x1
jax: 0.10.0
libtpu: 0.0.40
codegen_flags: <defaults>
</compile_context>

<pallas_src>
import jax
import jax.numpy as jnp
from jax import lax
from jax.experimental import pallas as pl
from jax.experimental.pallas import tpu as pltpu

_EPS = 1e-12  # F.normalize default eps


def _round_up(x, m):
    return ((x + m - 1) // m) * m


def _vmem_capacity_bytes():
    try:
        return int(pltpu.get_tpu_info().vmem_capacity_bytes)
    except Exception:
        return 64 << 20  # conservative fallback (v7x per-TensorCore VMEM)


def _per_col_vmem_bytes(D, fused):
    """VMEM bytes needed per batch column (inputs + pipelined output block)."""
    Dp = _round_up(max(D, 1), 128)          # lane padding for D < 128
    in_bufs = 1 if fused else 2             # scratch vs. double-buffered BlockSpec
    return 4 * in_bufs * Dp * 4 + 2 * 128 * 4


def _choose_tile(B, D, *, fused, max_tb=None):
    per_col = _per_col_vmem_bytes(D, fused)
    budget = int(_vmem_capacity_bytes() * 0.4)
    cap = max(128, (budget // per_col // 128) * 128)
    if max_tb is not None:
        cap = min(cap, max_tb)
    b128 = _round_up(B, 128)
    if b128 >= 256:
        # Keep >= 2 grid steps so v7x's two TensorCores both get work.
        cap = min(cap, _round_up(b128 // 2, 128))
    return min(cap, b128)


def _scores(h, r, t, n):
    """TransE score math on (tb, D) tiles -> (tb, 4) [pos, neg1, neg2, dist]."""
    def sumsq(x):                       # lane-axis reduce -> (tb, 1)
        return jnp.sum(x * x, axis=-1, keepdims=True)

    def normalize(x):                   # F.normalize(x, 2, -1) == x / max(||x||, eps)
        return x * lax.rsqrt(jnp.maximum(sumsq(x), _EPS * _EPS))

    def neg_l2(x):                      # -torch.norm(x, 2, -1)
        return -jnp.sqrt(sumsq(x))

    hn = normalize(h)
    tn = normalize(t)
    nn_ = normalize(n)
    d = r - tn
    pos = neg_l2(hn + d)                # calc_score_head(h,r,t) == calc_score_tail(h,r,t)
    neg1 = neg_l2(nn_ + d)              # calc_score_head(n, r, t)
    neg2 = neg_l2(hn + (r - nn_))       # calc_score_tail(h, r, n)
    dist = jnp.sqrt(sumsq(h - t))       # per-row ||h - t|| on UN-normalized rows
    return jnp.concatenate([pos, neg1, neg2, dist], axis=-1)


def _transe_kernel(h_ref, r_ref, t_ref, n_ref, out_ref):
    """Pre-gathered path: rows already in (tb, D) VMEM blocks."""
    out_ref[...] = _scores(h_ref[...], r_ref[...], t_ref[...], n_ref[...])


def _transe_gather_kernel(bh_ref, br_ref, bt_ref, bn_ref,   # scalar prefetch (SMEM)
                          ent_ref, rel_ref,                  # raw HBM refs (pl.ANY)
                          out_ref,                           # (tb, 4) VMEM block
                          h_buf, r_buf, t_buf, n_buf, sem):  # scratch
    """Fused-gather path: DMA the tile's rows straight out of the tables."""
    tb = h_buf.shape[0]
    base = pl.program_id(0) * tb

    @pl.loop(0, tb)
    def _issue(j):
        pltpu.make_async_copy(ent_ref.at[pl.ds(bh_ref[base + j], 1), :],
                              h_buf.at[pl.ds(j, 1), :], sem).start()
        pltpu.make_async_copy(rel_ref.at[pl.ds(br_ref[base + j], 1), :],
                              r_buf.at[pl.ds(j, 1), :], sem).start()
        pltpu.make_async_copy(ent_ref.at[pl.ds(bt_ref[base + j], 1), :],
                              t_buf.at[pl.ds(j, 1), :], sem).start()
        pltpu.make_async_copy(ent_ref.at[pl.ds(bn_ref[base + j], 1), :],
                              n_buf.at[pl.ds(j, 1), :], sem).start()

    @pl.loop(0, tb)
    def _drain(j):
        # Placeholder descriptors with matching shapes just to wait on `sem`.
        pltpu.make_async_copy(ent_ref.at[pl.ds(0, 1), :], h_buf.at[pl.ds(0, 1), :], sem).wait()
        pltpu.make_async_copy(rel_ref.at[pl.ds(0, 1), :], r_buf.at[pl.ds(0, 1), :], sem).wait()
        pltpu.make_async_copy(ent_ref.at[pl.ds(0, 1), :], t_buf.at[pl.ds(0, 1), :], sem).wait()
        pltpu.make_async_copy(ent_ref.at[pl.ds(0, 1), :], n_buf.at[pl.ds(0, 1), :], sem).wait()

    out_ref[...] = _scores(h_buf[...], r_buf[...], t_buf[...], n_buf[...])


def transe_forward(ent_emb, rel_emb, batch_head, batch_rel, batch_tail,
                   batch_negative, *, tb=None, fuse_gather=None):
    ent_emb = jnp.asarray(ent_emb, jnp.float32)
    rel_emb = jnp.asarray(rel_emb, jnp.float32)
    D = ent_emb.shape[1]
    B = batch_head.shape[0]

    if fuse_gather is None:
        fuse_gather = (D * 4) >= 512        # rows big enough to be DMA-worthy

    if tb is None:
        # Cap the fused tile to bound per-step outstanding row DMAs.
        tb = _choose_tile(B, D, fused=fuse_gather,
                          max_tb=2048 if fuse_gather else None)
    num_tiles = -(-B // tb)
    Bp = num_tiles * tb
    pad = Bp - B

    needed = tb * _per_col_vmem_bytes(D, fuse_gather)
    phys = _vmem_capacity_bytes()
    vmem_limit = min(int(phys * 0.9), max(32 << 20, needed + (8 << 20)))
    if needed > vmem_limit:
        # TODO(synk): tile over D ('arbitrary' grid axis + resident sumsq accumulator)
        raise ValueError(
            f"TransE tile needs ~{needed >> 20} MiB VMEM (> {vmem_limit >> 20} MiB); "
            f"reduce dim or add D-tiling.")

    # Pad the index vectors with 0 so padded head/tail rows are identical
    # -> their ||h - t|| contribution is exactly 0; padded scores are sliced off.
    # (Correctness relies on head/tail being padded with the SAME index.)
    bh = jnp.pad(batch_head, (0, pad)).astype(jnp.int32)
    br = jnp.pad(batch_rel, (0, pad)).astype(jnp.int32)
    bt = jnp.pad(batch_tail, (0, pad)).astype(jnp.int32)
    bn = jnp.pad(batch_negative, (0, pad)).astype(jnp.int32)

    cost = pl.CostEstimate(
        flops=int(24 * D * Bp),
        transcendentals=int(8 * Bp),
        bytes_accessed=int(4 * Bp * D * 4 + Bp * 4 * 4 + 4 * Bp * 4))
    cparams = pltpu.CompilerParams(
        dimension_semantics=("parallel",),    # no cross-tile state
        vmem_limit_bytes=int(vmem_limit))

    if fuse_gather:
        out = pl.pallas_call(
            _transe_gather_kernel,
            out_shape=jax.ShapeDtypeStruct((Bp, 4), jnp.float32),
            grid_spec=pltpu.PrefetchScalarGridSpec(
                num_scalar_prefetch=4,
                grid=(num_tiles,),
                in_specs=[pl.BlockSpec(memory_space=pl.ANY),   # ent table stays in HBM
                          pl.BlockSpec(memory_space=pl.ANY)],  # rel table stays in HBM
                out_specs=pl.BlockSpec((tb, 4), lambda i, bh, br, bt, bn: (i, 0)),
                scratch_shapes=[pltpu.VMEM((tb, D), jnp.float32)] * 4
                               + [pltpu.SemaphoreType.DMA(())],
            ),
            compiler_params=cparams,
            cost_estimate=cost,
        )(bh, br, bt, bn, ent_emb, rel_emb)
    else:
        # Small rows: XLA gather is cheaper than per-row DMA; natural (Bp, D)
        # layout (no transpose relayout).
        h = ent_emb[bh]
        r = rel_emb[br]
        t = ent_emb[bt]
        n = ent_emb[bn]
        in_spec = pl.BlockSpec((tb, D), lambda i: (i, 0))
        out = pl.pallas_call(
            _transe_kernel,
            out_shape=jax.ShapeDtypeStruct((Bp, 4), jnp.float32),
            grid_spec=pltpu.PrefetchScalarGridSpec(
                num_scalar_prefetch=0,
                grid=(num_tiles,),
                in_specs=[in_spec] * 4,
                out_specs=pl.BlockSpec((tb, 4), lambda i: (i, 0)),
            ),
            compiler_params=cparams,
            cost_estimate=cost,
        )(h, r, t, n)

    pos = out[:B, 0]
    pos_score = jnp.concatenate([pos, pos], axis=-1)              # head/tail pos identical
    neg_score = jnp.concatenate([out[:B, 1], out[:B, 2]], axis=-1)
    dist = jnp.sum(out[:B, 3])
    return pos_score, neg_score, dist


def ref_forward(ent_emb, rel_emb, bh, br, bt, bn):
    h, r, t, n = ent_emb[bh], rel_emb[br], ent_emb[bt], ent_emb[bn]

    def normalize(x):
        nrm = jnp.linalg.norm(x, axis=-1, keepdims=True)
        return x / jnp.maximum(nrm, _EPS)

    hn, tn, nn_ = normalize(h), normalize(t), normalize(n)
    p1 = -jnp.linalg.norm(hn + r - tn, axis=-1)
    p2 = -jnp.linalg.norm(hn + (r - tn), axis=-1)
    n1 = -jnp.linalg.norm(nn_ + r - tn, axis=-1)
    n2 = -jnp.linalg.norm(hn + (r - nn_), axis=-1)
    pos = jnp.concatenate([p1, p2], axis=-1)
    neg = jnp.concatenate([n1, n2], axis=-1)
    dist = jnp.sum(jnp.linalg.norm(h - t, axis=-1))
    return pos, neg, dist


def _make_case(key, ent_tot, rel_tot, dim, B):
    k_ent, k_rel, k_h, k_r, k_t, k_n = jax.random.split(key, 6)
    # Deterministic xavier_uniform_ init: U(-a, a), a = sqrt(6 / (fan_in + fan_out))
    a_ent = (6.0 / (ent_tot + dim)) ** 0.5
    a_rel = (6.0 / (rel_tot + dim)) ** 0.5
    ent = jax.random.uniform(k_ent, (ent_tot, dim), jnp.float32, -a_ent, a_ent)
    rel = jax.random.uniform(k_rel, (rel_tot, dim), jnp.float32, -a_rel, a_rel)
    bh = jax.random.randint(k_h, (B,), 0, ent_tot)
    br = jax.random.randint(k_r, (B,), 0, rel_tot)
    bt = jax.random.randint(k_t, (B,), 0, ent_tot)
    bn = jax.random.randint(k_n, (B,), 0, ent_tot)
    return ent, rel, bh, br, bt, bn


if __name__ == "__main__":
    key = jax.random.PRNGKey(0)
    k1, k2 = jax.random.split(key)

    # Case 1: small dim (D=32) -> XLA gather + Pallas scoring kernel.
    args1 = _make_case(k1, ent_tot=32, rel_tot=16, dim=32, B=16)
    pos1, neg1, dist1 = jax.block_until_ready(transe_forward(*args1))
    rpos1, rneg1, rdist1 = ref_forward(*args1)
    assert pos1.shape == (32,) and neg1.shape == (32,) and dist1.shape == ()
    assert jnp.allclose(pos1, rpos1, atol=2e-5)
    assert jnp.allclose(neg1, rneg1, atol=2e-5)
    assert jnp.allclose(dist1, rdist1, rtol=1e-5, atol=1e-4)

    # Case 2: DMA-worthy rows (D=128) -> fused in-kernel gather, 2 grid tiles.
    args2 = _make_case(k2, ent_tot=64, rel_tot=16, dim=128, B=200)
    pos2, neg2, dist2 = jax.block_until_ready(transe_forward(*args2))
    rpos2, rneg2, rdist2 = ref_forward(*args2)
    assert pos2.shape == (400,) and neg2.shape == (400,) and dist2.shape == ()
    assert jnp.allclose(pos2, rpos2, atol=2e-5)
    assert jnp.allclose(neg2, rneg2, atol=2e-5)
    assert jnp.allclose(dist2, rdist2, rtol=1e-5, atol=1e-3)

    print("KERNEL_OK")
</pallas_src>

<mosaic_0001>
module attributes {stable_mosaic.version = 11 : i64} {
  func.func @_transe_kernel(%arg0: i32, %arg1: memref<128x32xf32, #tpu.memory_space<vmem>>, %arg2: memref<128x32xf32, #tpu.memory_space<vmem>>, %arg3: memref<128x32xf32, #tpu.memory_space<vmem>>, %arg4: memref<128x32xf32, #tpu.memory_space<vmem>>, %arg5: memref<128x4xf32, #tpu.memory_space<vmem>>) attributes {dimension_semantics = [#tpu.dimension_semantics<parallel>], iteration_bounds = array<i64: 1>, scalar_prefetch = 0 : i64, scratch_operands = 0 : i64, tpu.core_type = #tpu.core_type<tc>, window_params = [{transform_indices = @transform_0, window_bounds = array<i64: 128, 32>}, {transform_indices = @transform_1, window_bounds = array<i64: 128, 32>}, {transform_indices = @transform_2, window_bounds = array<i64: 128, 32>}, {transform_indices = @transform_3, window_bounds = array<i64: 128, 32>}, {transform_indices = @transform_4, window_bounds = array<i64: 128, 4>}]} {
    %c0 = arith.constant 0 : index
    %c0_0 = arith.constant 0 : index
    %0 = vector.load %arg1[%c0, %c0_0] : memref<128x32xf32, #tpu.memory_space<vmem>>, vector<128x32xf32>
    %c0_1 = arith.constant 0 : index
    %c0_2 = arith.constant 0 : index
    %1 = vector.load %arg2[%c0_1, %c0_2] : memref<128x32xf32, #tpu.memory_space<vmem>>, vector<128x32xf32>
    %c0_3 = arith.constant 0 : index
    %c0_4 = arith.constant 0 : index
    %2 = vector.load %arg3[%c0_3, %c0_4] : memref<128x32xf32, #tpu.memory_space<vmem>>, vector<128x32xf32>
    %c0_5 = arith.constant 0 : index
    %c0_6 = arith.constant 0 : index
    %3 = vector.load %arg4[%c0_5, %c0_6] : memref<128x32xf32, #tpu.memory_space<vmem>>, vector<128x32xf32>
    %4 = arith.mulf %0, %0 : vector<128x32xf32>
    %cst = arith.constant dense<0.000000e+00> : vector<128xf32>
    %5 = vector.multi_reduction <add>, %4, %cst [1] : vector<128x32xf32> to vector<128xf32>
    %6 = vector.shape_cast %5 : vector<128xf32> to vector<128x1xf32>
    %cst_7 = arith.constant 1.000000e-24 : f32
    %7 = vector.broadcast %cst_7 : f32 to vector<128x1xf32>
    %8 = arith.maximumf %6, %7 : vector<128x1xf32>
    %9 = math.rsqrt %8 : vector<128x1xf32>
    %10 = vector.broadcast %9 : vector<128x1xf32> to vector<128x32xf32>
    %11 = arith.mulf %0, %10 : vector<128x32xf32>
    %12 = arith.mulf %2, %2 : vector<128x32xf32>
    %cst_8 = arith.constant dense<0.000000e+00> : vector<128xf32>
    %13 = vector.multi_reduction <add>, %12, %cst_8 [1] : vector<128x32xf32> to vector<128xf32>
    %14 = vector.shape_cast %13 : vector<128xf32> to vector<128x1xf32>
    %cst_9 = arith.constant 1.000000e-24 : f32
    %15 = vector.broadcast %cst_9 : f32 to vector<128x1xf32>
    %16 = arith.maximumf %14, %15 : vector<128x1xf32>
    %17 = math.rsqrt %16 : vector<128x1xf32>
    %18 = vector.broadcast %17 : vector<128x1xf32> to vector<128x32xf32>
    %19 = arith.mulf %2, %18 : vector<128x32xf32>
    %20 = arith.mulf %3, %3 : vector<128x32xf32>
    %cst_10 = arith.constant dense<0.000000e+00> : vector<128xf32>
    %21 = vector.multi_reduction <add>, %20, %cst_10 [1] : vector<128x32xf32> to vector<128xf32>
    %22 = vector.shape_cast %21 : vector<128xf32> to vector<128x1xf32>
    %cst_11 = arith.constant 1.000000e-24 : f32
    %23 = vector.broadcast %cst_11 : f32 to vector<128x1xf32>
    %24 = arith.maximumf %22, %23 : vector<128x1xf32>
    %25 = math.rsqrt %24 : vector<128x1xf32>
    %26 = vector.broadcast %25 : vector<128x1xf32> to vector<128x32xf32>
    %27 = arith.mulf %3, %26 : vector<128x32xf32>
    %28 = arith.subf %1, %19 : vector<128x32xf32>
    %29 = arith.addf %11, %28 : vector<128x32xf32>
    %30 = arith.mulf %29, %29 : vector<128x32xf32>
    %cst_12 = arith.constant dense<0.000000e+00> : vector<128xf32>
    %31 = vector.multi_reduction <add>, %30, %cst_12 [1] : vector<128x32xf32> to vector<128xf32>
    %32 = vector.shape_cast %31 : vector<128xf32> to vector<128x1xf32>
    %33 = math.sqrt %32 : vector<128x1xf32>
    %cst_13 = arith.constant 0.000000e+00 : f32
    %34 = vector.broadcast %cst_13 : f32 to vector<128x1xf32>
    %35 = arith.subf %34, %33 : vector<128x1xf32>
    %36 = arith.addf %27, %28 : vector<128x32xf32>
    %37 = arith.mulf %36, %36 : vector<128x32xf32>
    %cst_14 = arith.constant dense<0.000000e+00> : vector<128xf32>
    %38 = vector.multi_reduction <add>, %37, %cst_14 [1] : vector<128x32xf32> to vector<128xf32>
    %39 = vector.shape_cast %38 : vector<128xf32> to vector<128x1xf32>
    %40 = math.sqrt %39 : vector<128x1xf32>
    %cst_15 = arith.constant 0.000000e+00 : f32
    %41 = vector.broadcast %cst_15 : f32 to vector<128x1xf32>
    %42 = arith.subf %41, %40 : vector<128x1xf32>
    %43 = arith.subf %1, %27 : vector<128x32xf32>
    %44 = arith.addf %11, %43 : vector<128x32xf32>
    %45 = arith.mulf %44, %44 : vector<128x32xf32>
    %cst_16 = arith.constant dense<0.000000e+00> : vector<128xf32>
    %46 = vector.multi_reduction <add>, %45, %cst_16 [1] : vector<128x32xf32> to vector<128xf32>
    %47 = vector.shape_cast %46 : vector<128xf32> to vector<128x1xf32>
    %48 = math.sqrt %47 : vector<128x1xf32>
    %cst_17 = arith.constant 0.000000e+00 : f32
    %49 = vector.broadcast %cst_17 : f32 to vector<128x1xf32>
    %50 = arith.subf %49, %48 : vector<128x1xf32>
    %51 = arith.subf %0, %2 : vector<128x32xf32>
    %52 = arith.mulf %51, %51 : vector<128x32xf32>
    %cst_18 = arith.constant dense<0.000000e+00> : vector<128xf32>
    %53 = vector.multi_reduction <add>, %52, %cst_18 [1] : vector<128x32xf32> to vector<128xf32>
    %54 = vector.shape_cast %53 : vector<128xf32> to vector<128x1xf32>
    %55 = math.sqrt %54 : vector<128x1xf32>
    %56 = tpu.concatenate %35, %42, %50, %55 in 1 : vector<128x1xf32>, vector<128x1xf32>, vector<128x1xf32>, vector<128x1xf32> -> vector<128x4xf32>
    %c0_19 = arith.constant 0 : index
    %c0_20 = arith.constant 0 : index
    %57 = vector.load %arg5[%c0_19, %c0_20] : memref<128x4xf32, #tpu.memory_space<vmem>>, vector<128x4xf32>
    tpu.vector_store %arg5[%c0_19, %c0_20], %56 {strides = array<i32>} : memref<128x4xf32, #tpu.memory_space<vmem>>, vector<128x4xf32>,
    return
  }
  func.func @transform_0(%arg0: i32) -> (i32, i32) {
    %c0_i32 = arith.constant 0 : i32
    %c0_i32_0 = arith.constant 0 : i32
    return %arg0, %c0_i32 : i32, i32
  }
  func.func @transform_1(%arg0: i32) -> (i32, i32) {
    %c0_i32 = arith.constant 0 : i32
    %c0_i32_0 = arith.constant 0 : i32
    return %arg0, %c0_i32 : i32, i32
  }
  func.func @transform_2(%arg0: i32) -> (i32, i32) {
    %c0_i32 = arith.constant 0 : i32
    %c0_i32_0 = arith.constant 0 : i32
    return %arg0, %c0_i32 : i32, i32
  }
  func.func @transform_3(%arg0: i32) -> (i32, i32) {
    %c0_i32 = arith.constant 0 : i32
    %c0_i32_0 = arith.constant 0 : i32
    return %arg0, %c0_i32 : i32, i32
  }
  func.func @transform_4(%arg0: i32) -> (i32, i32) {
    %c0_i32 = arith.constant 0 : i32
    %c0_i32_0 = arith.constant 0 : i32
    return %arg0, %c0_i32 : i32, i32
  }
}

</mosaic_0001>

<bundles_post_ra>
// kernel: tpu_custom_call.1
= control target key start
LH: loop header
LB: loop body
LE: loop exit
PB: predicated region body
PF: predicated region fallthrough
CT: control target
= control target key end

     0   :  { %vm97_vm0 = vcmask 261120   ;;  %s3524_s0 = inlined_call_operand.vmem [shape: f32[128,32], index: 0, kind: input, shape index: {}]   ;;  %s3525_s2 = inlined_call_operand.vmem [shape: f32[128,32], index: 2, kind: input, shape index: {}]   ;;  %s3526_s3 = inlined_call_operand.vmem [shape: f32[128,32], index: 3, kind: input, shape index: {}]   ;;  %s3527_s1 = inlined_call_operand.vmem [shape: f32[128,32], index: 1, kind: input, shape index: {}]   ;;  %s3528_s4 = inlined_call_operand.vmem [shape: f32[128,4], index: 4, kind: output, shape index: {}]  }
   0x1   :  { %v1622_v0 = vld [vmem:[%s3524_s0 + $0x10] sm:$0xff]  ;;  %v1627_v1 = vld [vmem:[%s3524_s0] sm:$0xff]  ;;  %v1632_v2 = vld [vmem:[%s3524_s0 + $0x18] sm:$0xff] }
   0x2   :  { %v83_v3 = vmul.f32 %v1622_v0, %v1622_v0  ;;  %v81_v4 = vmul.f32 %v1627_v1, %v1627_v1  ;;  %v84_v5 = vmul.f32 %v1632_v2, %v1632_v2  ;;  %v1643_v6 = vld [vmem:[%s3524_s0 + $0x8] sm:$0xff]  ;;  %v1655_v9 = vld [vmem:[%s3524_s0 + $0x20] sm:$0xff]  ;;  %v1668_v16 = vld [vmem:[%s3524_s0 + $0x38] sm:$0xff] }
   0x3   :  { %v82_v7 = vmul.f32 %v1643_v6, %v1643_v6  ;;  %v1650_v8 = vld [vmem:[%s3524_s0 + $0x28] sm:$0xff]  ;;  %v85_v15 = vmul.f32 %v1655_v9, %v1655_v9  ;;  %v1673_v17 = vld [vmem:[%s3524_s0 + $0x30] sm:$0xff]  ;;  %v88_v20 = vmul.f32 %v1668_v16, %v1668_v16  ;;  %v1689_v23 = vld [vmem:[%s3524_s0 + $0x40] sm:$0xff] }
   0x4   :  { %v104_v10 = vsel %vm97_vm0, %v83_v3, 0.0  ;;  %v98_v11 = vsel %vm97_vm0, %v81_v4, 0.0  ;;  %v107_v12 = vsel %vm97_vm0, %v84_v5, 0.0  ;;  %v86_v14 = vmul.f32 %v1650_v8, %v1650_v8  ;;  %v1684_v22 = vld [vmem:[%s3524_s0 + $0x48] sm:$0xff]  ;;  %v1700_v28 = vld [vmem:[%s3524_s0 + $0x58] sm:$0xff]  ;;  %v1705_v29 = vld [vmem:[%s3524_s0 + $0x50] sm:$0xff] }
   0x5   :  { %105 = vadd.xlane.f32.xlu1 %v104_v10  ;;  %99 = vadd.xlane.f32.xlu0 %v98_v11  ;;  %v101_v13 = vsel %vm97_vm0, %v82_v7, 0.0  ;;  %v110_v19 = vsel %vm97_vm0, %v85_v15, 0.0  ;;  %v87_v21 = vmul.f32 %v1673_v17, %v1673_v17  ;;  %v119_v24 = vsel %vm97_vm0, %v88_v20, 0.0  ;;  %v1716_v34 = vld [vmem:[%s3524_s0 + $0x68] sm:$0xff]  ;;  %v1721_v35 = vld [vmem:[%s3524_s0 + $0x60] sm:$0xff]  ;;  %v1732_v40 = vld [vmem:[%s3524_s0 + $0x78] sm:$0xff] }
   0x6   :  { %v113_v18 = vsel %vm97_vm0, %v86_v14, 0.0  ;;  %v90_v26 = vmul.f32 %v1684_v22, %v1684_v22  ;;  %v89_v27 = vmul.f32 %v1689_v23, %v1689_v23  ;;  %v92_v32 = vmul.f32 %v1700_v28, %v1700_v28  ;;  %v1737_v41 = vld [vmem:[%s3524_s0 + $0x70] sm:$0xff]  ;;  %v1748_v46 = vld [vmem:[%s3525_s2 + $0x8] sm:$0xff]  ;;  %v1753_v47 = vld [vmem:[%s3525_s2] sm:$0xff] }
   0x7   :  { %v116_v25 = vsel %vm97_vm0, %v87_v21, 0.0  ;;  %v91_v33 = vmul.f32 %v1705_v29, %v1705_v29  ;;  %v94_v38 = vmul.f32 %v1716_v34, %v1716_v34  ;;  %v93_v39 = vmul.f32 %v1721_v35, %v1721_v35  ;;  %v1764_v52 = vld [vmem:[%s3525_s2 + $0x18] sm:$0xff]  ;;  %v1769_v53 = vld [vmem:[%s3525_s2 + $0x10] sm:$0xff]  ;;  %v1780_v58 = vld [vmem:[%s3525_s2 + $0x28] sm:$0xff] }
   0x8   :  { %v125_v30 = vsel %vm97_vm0, %v90_v26, 0.0  ;;  %v122_v31 = vsel %vm97_vm0, %v89_v27, 0.0  ;;  %v131_v36 = vsel %vm97_vm0, %v92_v32, 0.0  ;;  %v96_v44 = vmul.f32 %v1732_v40, %v1732_v40  ;;  %v1785_v59 = vld [vmem:[%s3525_s2 + $0x20] sm:$0xff]  ;;  %v1796_v3 = vld [vmem:[%s3525_s2 + $0x38] sm:$0xff]  ;;  %v1801_v4 = vld [vmem:[%s3525_s2 + $0x30] sm:$0xff] }
   0x9   :  { %108 = vadd.xlane.f32.xlu1 %v107_v12  ;;  %102 = vadd.xlane.f32.xlu0 %v101_v13  ;;  %v128_v37 = vsel %vm97_vm0, %v91_v33, 0.0  ;;  %v137_v42 = vsel %vm97_vm0, %v94_v38, 0.0  ;;  %v134_v43 = vsel %vm97_vm0, %v93_v39, 0.0  ;;  %v95_v45 = vmul.f32 %v1737_v41, %v1737_v41  ;;  %v1812_v12 = vld [vmem:[%s3525_s2 + $0x48] sm:$0xff]  ;;  %v1817_v13 = vld [vmem:[%s3525_s2 + $0x40] sm:$0xff]  ;;  %v1828_v20 = vld [vmem:[%s3525_s2 + $0x58] sm:$0xff] }
   0xa   :  { %v143_v48 = vsel %vm97_vm0, %v96_v44, 0.0  ;;  %v195_v50 = vmul.f32 %v1748_v46, %v1748_v46  ;;  %v194_v51 = vmul.f32 %v1753_v47, %v1753_v47  ;;  %v197_v56 = vmul.f32 %v1764_v52, %v1764_v52  ;;  %v1833_v21 = vld [vmem:[%s3525_s2 + $0x50] sm:$0xff]  ;;  %v1860_v38 = vld [vmem:[%s3525_s2 + $0x78] sm:$0xff] }
   0xb   :  { %v140_v49 = vsel %vm97_vm0, %v95_v45, 0.0  ;;  %v196_v57 = vmul.f32 %v1769_v53, %v1769_v53  ;;  %v199_v62 = vmul.f32 %v1780_v58, %v1780_v58  ;;  %v198_v63 = vmul.f32 %v1785_v59, %v1785_v59  ;;  %v1865_v39 = vld [vmem:[%s3525_s2 + $0x70] sm:$0xff] }
   0xc   :  { %v213_v54 = vsel %vm97_vm0, %v195_v50, 0.0  ;;  %v210_v55 = vsel %vm97_vm0, %v194_v51, 0.0  ;;  %v219_v60 = vsel %vm97_vm0, %v197_v56, 0.0  ;;  %v201_v10 = vmul.f32 %v1796_v3, %v1796_v3  ;;  %v1892_v56 = vld [vmem:[%s3526_s3 + $0x18] sm:$0xff] }
   0xd   :  { %114 = vadd.xlane.f32.xlu1 %v113_v18  ;;  %111 = vadd.xlane.f32.xlu0 %v110_v19  ;;  %v216_v61 = vsel %vm97_vm0, %v196_v57, 0.0  ;;  %v225_v5 = vsel %vm97_vm0, %v199_v62, 0.0  ;;  %v222_v7 = vsel %vm97_vm0, %v198_v63, 0.0  ;;  %v200_v11 = vmul.f32 %v1801_v4, %v1801_v4  ;;  %v1897_v57 = vld [vmem:[%s3526_s3 + $0x10] sm:$0xff] }
   0xe   :  { %v231_v14 = vsel %vm97_vm0, %v201_v10, 0.0  ;;  %v203_v18 = vmul.f32 %v1812_v12, %v1812_v12  ;;  %v202_v19 = vmul.f32 %v1817_v13, %v1817_v13  ;;  %v205_v26 = vmul.f32 %v1828_v20, %v1828_v20 }
   0xf   :  { %v228_v15 = vsel %vm97_vm0, %v200_v11, 0.0  ;;  %v204_v27 = vmul.f32 %v1833_v21, %v1833_v21  ;;  %v209_v44 = vmul.f32 %v1860_v38, %v1860_v38  ;;  %v208_v45 = vmul.f32 %v1865_v39, %v1865_v39 }
  0x10   :  { %v243_v32 = vsel %vm97_vm0, %v205_v26, 0.0  ;;  %v309_v62 = vmul.f32 %v1892_v56, %v1892_v56  ;;  %v308_v63 = vmul.f32 %v1897_v57, %v1897_v57 }
  0x11   :  { %120 = vadd.xlane.f32.xlu1 %v119_v24  ;;  %117 = vadd.xlane.f32.xlu0 %v116_v25  ;;  %v237_v24 = vsel %vm97_vm0, %v203_v18, 0.0  ;;  %v234_v25 = vsel %vm97_vm0, %v202_v19, 0.0  ;;  %v240_v33 = vsel %vm97_vm0, %v204_v27, 0.0  ;;  %v255_v50 = vsel %vm97_vm0, %v209_v44, 0.0  ;;  %v1924_v18 = vld [vmem:[%s3526_s3 + $0x38] sm:$0xff]  ;;  %v1929_v19 = vld [vmem:[%s3526_s3 + $0x30] sm:$0xff] }
  0x12   :  { %v252_v51 = vsel %vm97_vm0, %v208_v45, 0.0  ;;  %v331_v10 = vsel %vm97_vm0, %v309_v62, 0.0  ;;  %v328_v11 = vsel %vm97_vm0, %v308_v63, 0.0  ;;  %3549 = vst [vmem:[#allocation3_spill] sm:$0xff] %v1924_v18  ;;  %3550 = vst [vmem:[#allocation4_spill] sm:$0xff] %v1929_v19  ;;  %v313_v26 = vmul.f32 %v1924_v18, %v1924_v18  ;;  %v1956_v44 = vld [vmem:[%s3526_s3 + $0x58] sm:$0xff] }
  0x13   :  { %v312_v27 = vmul.f32 %v1929_v19, %v1929_v19  ;;  %3553 = vst [vmem:[#allocation7_spill] sm:$0xff] %v1956_v44  ;;  %v1961_v45 = vld [vmem:[%s3526_s3 + $0x50] sm:$0xff] }
  0x14   :  { %3554 = vst [vmem:[#allocation8_spill] sm:$0xff] %v1961_v45 }
  0x15   :  { %126 = vadd.xlane.f32.xlu1 %v125_v30  ;;  %123 = vadd.xlane.f32.xlu0 %v122_v31  ;;  %v1844_v30 = vld [vmem:[%s3525_s2 + $0x68] sm:$0xff]  ;;  %v1849_v31 = vld [vmem:[%s3525_s2 + $0x60] sm:$0xff] }
  0x19   :  { %132 = vadd.xlane.f32.xlu1 %v131_v36  ;;  %129 = vadd.xlane.f32.xlu0 %v128_v37  ;;  %v207_v36 = vmul.f32 %v1844_v30, %v1844_v30  ;;  %v206_v37 = vmul.f32 %v1849_v31, %v1849_v31 }
  0x1d   :  { %138 = vadd.xlane.f32.xlu1 %v137_v42  ;;  %135 = vadd.xlane.f32.xlu0 %v134_v43  ;;  %v249_v42 = vsel %vm97_vm0, %v207_v36, 0.0  ;;  %v246_v43 = vsel %vm97_vm0, %v206_v37, 0.0  ;;  %v343_v36 = vsel %vm97_vm0, %v313_v26, 0.0  ;;  %v340_v37 = vsel %vm97_vm0, %v312_v27, 0.0 }
  0x21   :  { %144 = vadd.xlane.f32.xlu1 %v143_v48  ;;  %141 = vadd.xlane.f32.xlu0 %v140_v49  ;;  %v1876_v48 = vld [vmem:[%s3526_s3 + $0x8] sm:$0xff]  ;;  %v1881_v49 = vld [vmem:[%s3526_s3] sm:$0xff] }
  0x25   :  { %214 = vadd.xlane.f32.xlu1 %v213_v54  ;;  %211 = vadd.xlane.f32.xlu0 %v210_v55  ;;  %v307_v54 = vmul.f32 %v1876_v48, %v1876_v48  ;;  %v306_v55 = vmul.f32 %v1881_v49, %v1881_v49 }
  0x29   :  { %220 = vadd.xlane.f32.xlu1 %v219_v60  ;;  %217 = vadd.xlane.f32.xlu0 %v216_v61  ;;  %v325_v60 = vsel %vm97_vm0, %v307_v54, 0.0  ;;  %v322_v61 = vsel %vm97_vm0, %v306_v55, 0.0  ;;  %v317_v54 = vmul.f32 %v1956_v44, %v1956_v44  ;;  %v316_v55 = vmul.f32 %v1961_v45, %v1961_v45 }
  0x2b   :  { %v355_v62 = vsel %vm97_vm0, %v317_v54, 0.0  ;;  %v352_v63 = vsel %vm97_vm0, %v316_v55, 0.0 }
  0x2d   :  { %226 = vadd.xlane.f32.xlu1 %v225_v5  ;;  %223 = vadd.xlane.f32.xlu0 %v222_v7  ;;  %v1908_v5 = vld [vmem:[%s3526_s3 + $0x28] sm:$0xff]  ;;  %v1913_v7 = vld [vmem:[%s3526_s3 + $0x20] sm:$0xff] }
  0x2e   :  { %3548 = vst [vmem:[#allocation2_spill] sm:$0xff] %v1913_v7 }
  0x31   :  { %232 = vadd.xlane.f32.xlu1 %v231_v14  ;;  %229 = vadd.xlane.f32.xlu0 %v228_v15  ;;  %v311_v14 = vmul.f32 %v1908_v5, %v1908_v5  ;;  %v310_v15 = vmul.f32 %v1913_v7, %v1913_v7 }
  0x35   :  { %238 = vadd.xlane.f32.xlu1 %v237_v24  ;;  %235 = vadd.xlane.f32.xlu0 %v234_v25  ;;  %v337_v24 = vsel %vm97_vm0, %v311_v14, 0.0  ;;  %v334_v25 = vsel %vm97_vm0, %v310_v15, 0.0  ;;  %v1988_v14 = vld [vmem:[%s3526_s3 + $0x78] sm:$0xff]  ;;  %v1993_v15 = vld [vmem:[%s3526_s3 + $0x70] sm:$0xff] }
  0x36   :  { %3557 = vst [vmem:[#allocation11_spill] sm:$0xff] %v1988_v14  ;;  %3558 = vst [vmem:[#allocation12_spill] sm:$0xff] %v1993_v15  ;;  %v321_v26 = vmul.f32 %v1988_v14, %v1988_v14  ;;  %v320_v27 = vmul.f32 %v1993_v15, %v1993_v15 }
  0x39   :  { %244 = vadd.xlane.f32.xlu1 %v243_v32  ;;  %241 = vadd.xlane.f32.xlu0 %v240_v33  ;;  %v1940_v32 = vld [vmem:[%s3526_s3 + $0x48] sm:$0xff]  ;;  %v1945_v33 = vld [vmem:[%s3526_s3 + $0x40] sm:$0xff] }
  0x3a   :  { %3551 = vst [vmem:[#allocation5_spill] sm:$0xff] %v1940_v32  ;;  %3552 = vst [vmem:[#allocation6_spill] sm:$0xff] %v1945_v33 }
  0x3d   :  { %250 = vadd.xlane.f32.xlu1 %v249_v42  ;;  %247 = vadd.xlane.f32.xlu0 %v246_v43  ;;  %v315_v42 = vmul.f32 %v1940_v32, %v1940_v32  ;;  %v314_v43 = vmul.f32 %v1945_v33, %v1945_v33 }
  0x41   :  { %256 = vadd.xlane.f32.xlu1 %v255_v50  ;;  %253 = vadd.xlane.f32.xlu0 %v252_v51  ;;  %v349_v50 = vsel %vm97_vm0, %v315_v42, 0.0  ;;  %v346_v51 = vsel %vm97_vm0, %v314_v43, 0.0 }
  0x45   :  { %326 = vadd.xlane.f32.xlu1 %v325_v60  ;;  %323 = vadd.xlane.f32.xlu0 %v322_v61  ;;  %v1972_v60 = vld [vmem:[%s3526_s3 + $0x68] sm:$0xff]  ;;  %v1977_v61 = vld [vmem:[%s3526_s3 + $0x60] sm:$0xff] }
  0x46   :  { %3555 = vst [vmem:[#allocation9_spill] sm:$0xff] %v1972_v60  ;;  %3556 = vst [vmem:[#allocation10_spill] sm:$0xff] %v1977_v61 }
  0x49   :  { %332 = vadd.xlane.f32.xlu1 %v331_v10  ;;  %329 = vadd.xlane.f32.xlu0 %v328_v11  ;;  %v319_v10 = vmul.f32 %v1972_v60, %v1972_v60  ;;  %v318_v11 = vmul.f32 %v1977_v61, %v1977_v61 }
  0x4d   :  { %338 = vadd.xlane.f32.xlu1 %v337_v24  ;;  %335 = vadd.xlane.f32.xlu0 %v334_v25  ;;  %v361_v24 = vsel %vm97_vm0, %v319_v10, 0.0  ;;  %v358_v25 = vsel %vm97_vm0, %v318_v11, 0.0 }
  0x51   :  { %344 = vadd.xlane.f32.xlu1 %v343_v36  ;;  %341 = vadd.xlane.f32.xlu0 %v340_v37  ;;  %v367_v36 = vsel %vm97_vm0, %v321_v26, 0.0  ;;  %v364_v37 = vsel %vm97_vm0, %v320_v27, 0.0 }
  0x55   :  { %350 = vadd.xlane.f32.xlu1 %v349_v50  ;;  %347 = vadd.xlane.f32.xlu0 %v346_v51 }
  0x59   :  { %356 = vadd.xlane.f32.xlu1 %v355_v62  ;;  %353 = vadd.xlane.f32.xlu0 %v352_v63 }
  0x5d   :  { %362 = vadd.xlane.f32.xlu1 %v361_v24  ;;  %359 = vadd.xlane.f32.xlu0 %v358_v25 }
  0x61   :  { %368 = vadd.xlane.f32.xlu1 %v367_v36  ;;  %365 = vadd.xlane.f32.xlu0 %v364_v37 }
  0x92   :  { %v106_v42 = vpop.xlane.xlu1 %105  ;;  %v100_v43 = vpop.xlane.xlu0 %99 }
  0x93   :  { %v148_v26 = vmax.f32 %v106_v42, 1e-24  ;;  %v146_v27 = vmax.f32 %v100_v43, 1e-24 }
  0x95   :  { %1338 = vrsqrt.f32 %v148_v26 }
  0x96   :  { %v109_v50 = vpop.xlane.xlu1 %108  ;;  %v103_v51 = vpop.xlane.xlu0 %102  ;;  %1340 = vrsqrt.f32 %v146_v27 }
  0x97   :  { %v149_v36 = vmax.f32 %v109_v50, 1e-24  ;;  %v147_v37 = vmax.f32 %v103_v51, 1e-24 }
  0x99   :  { %1342 = vrsqrt.f32 %v149_v36 }
  0x9a   :  { %v115_v54 = vpop.xlane.xlu1 %114  ;;  %v112_v55 = vpop.xlane.xlu0 %111  ;;  %1344 = vrsqrt.f32 %v147_v37 }
  0x9b   :  { %v151_v45 = vmax.f32 %v115_v54, 1e-24  ;;  %v150_v44 = vmax.f32 %v112_v55, 1e-24 }
  0x9d   :  { %1346 = vrsqrt.f32 %v151_v45 }
  0x9e   :  { %v121_v62 = vpop.xlane.xlu1 %120  ;;  %v118_v63 = vpop.xlane.xlu0 %117  ;;  %1348 = vrsqrt.f32 %v150_v44 }
  0x9f   :  { %v153_v19 = vmax.f32 %v121_v62, 1e-24  ;;  %v152_v42 = vmax.f32 %v118_v63, 1e-24  ;;  %v1339_v27 = vpop.eup %1338 }
  0xa0   :  { %v1341_v36 = vpop.eup %1340 }
  0xa2   :  { %v127_v10 = vpop.xlane.xlu1 %126  ;;  %v124_v11 = vpop.xlane.xlu0 %123 }
  0xa3   :  { %v155_v51 = vmax.f32 %v127_v10, 1e-24  ;;  %v154_v55 = vmax.f32 %v124_v11, 1e-24 }
  0xa6   :  { %v133_v14 = vpop.xlane.xlu1 %132  ;;  %v130_v15 = vpop.xlane.xlu0 %129 }
  0xa7   :  { %v156_v63 = vmax.f32 %v130_v15, 1e-24 }
  0xaa   :  { %v2003_v24 = vpop.xlane.xlu1 %138  ;;  %v2005_v25 = vpop.xlane.xlu0 %135 }
  0xab   :  { %v158_v15 = vmax.f32 %v2005_v25, 1e-24 }
  0xae   :  { %v2007_v61 = vpop.xlane.xlu1 %144  ;;  %v2009_v60 = vpop.xlane.xlu0 %141 }
  0xb2   :  { %v215_v33 = vpop.xlane.xlu1 %214  ;;  %v212_v32 = vpop.xlane.xlu0 %211 }
  0xb3   :  { %v259_v18 = vmax.f32 %v215_v33, 1e-24  ;;  %v258_v7 = vmax.f32 %v212_v32, 1e-24  ;;  %v1343_v33 = vpop.eup %1342  ;;  %v157_v32 = vmax.f32 %v133_v14, 1e-24 }
  0xb4   :  { %v159_v14 = vmax.f32 %v2003_v24, 1e-24  ;;  %v2028_v24 = vmul.f32 %v1341_v36, %v1627_v1 }
  0xb5   :  { %1350 = vrsqrt.f32 %v259_v18 }
  0xb6   :  { %1352 = vrsqrt.f32 %v258_v7  ;;  %v221_v43 = vpop.xlane.xlu1 %220  ;;  %v218_v50 = vpop.xlane.xlu0 %217 }
  0xb7   :  { %1354 = vrsqrt.f32 %v153_v19  ;;  %v261_v26 = vmax.f32 %v221_v43, 1e-24  ;;  %v260_v54 = vmax.f32 %v218_v50, 1e-24  ;;  %v1345_v7 = vpop.eup %1344 }
  0xb8   :  { %1356 = vrsqrt.f32 %v152_v42  ;;  %v1347_v19 = vpop.eup %1346  ;;  %v2014_v42 = vld [vmem:[%s3527_s1 + $0x8] sm:$0xff] }
  0xb9   :  { %1358 = vrsqrt.f32 %v261_v26  ;;  %v1349_v10 = vpop.eup %1348 }
  0xba   :  { %1360 = vrsqrt.f32 %v260_v54  ;;  %v227_v45 = vpop.xlane.xlu1 %226  ;;  %v224_v62 = vpop.xlane.xlu0 %223 }
  0xbb   :  { %1362 = vrsqrt.f32 %v155_v51  ;;  %v263_v44 = vmax.f32 %v227_v45, 1e-24  ;;  %v262_v18 = vmax.f32 %v224_v62, 1e-24  ;;  %v2025_v45 = vmul.f32 %v1339_v27, %v1622_v0 }
  0xbc   :  { %1364 = vrsqrt.f32 %v154_v55  ;;  %v2022_v55 = vld [vmem:[%s3527_s1] sm:$0xff]  ;;  %v2041_v27 = vmul.f32 %v1347_v19, %v1650_v8  ;;  %v2057_v19 = vld [vmem:[%s3527_s1 + $0x10] sm:$0xff] }
  0xbd   :  { %1366 = vrsqrt.f32 %v263_v44  ;;  %3559 = vst [vmem:[#allocation13_spill] sm:$0xff] %v2025_v45  ;;  %v2032_v44 = vmul.f32 %v1343_v33, %v1632_v2  ;;  %v2049_v33 = vld [vmem:[%s3527_s1 + $0x18] sm:$0xff] }
  0xbe   :  { %1368 = vrsqrt.f32 %v262_v18  ;;  %v233_v37 = vpop.xlane.xlu1 %232  ;;  %v230_v11 = vpop.xlane.xlu0 %229 }
  0xbf   :  { %v1351_v43 = vpop.eup %1350  ;;  %1370 = vrsqrt.f32 %v157_v32  ;;  %v265_v50 = vmax.f32 %v233_v37, 1e-24  ;;  %v264_v51 = vmax.f32 %v230_v11, 1e-24  ;;  %v2060_v37 = vmul.f32 %v1349_v10, %v1655_v9 }
  0xc0   :  { %v1353_v26 = vpop.eup %1352  ;;  %1372 = vrsqrt.f32 %v156_v63  ;;  %v291_v54 = vmul.f32 %v1351_v43, %v1748_v46  ;;  %v2035_v63 = vmul.f32 %v1345_v7, %v1643_v6 }
  0xc1   :  { %v1355_v62 = vpop.eup %1354  ;;  %1374 = vrsqrt.f32 %v265_v50  ;;  %v290_v32 = vmul.f32 %v1353_v26, %v1753_v47  ;;  %3560 = vst [vmem:[#allocation14_spill] sm:$0xff] %v2060_v37 }
  0xc2   :  { %v1357_v25 = vpop.eup %1356  ;;  %1376 = vrsqrt.f32 %v264_v51  ;;  %v239_v46 = vpop.xlane.xlu1 %238  ;;  %v2038_v0 = vsub.f32 %v2014_v42, %v291_v54  ;;  %v2068_v50 = vmul.f32 %v1355_v62, %v1668_v16  ;;  %v2084_v16 = vld [vmem:[%s3527_s1 + $0x28] sm:$0xff] }
  0xc3   :  { %v236_v18 = vpop.xlane.xlu0 %235  ;;  %v1359_v1 = vpop.eup %1358  ;;  %1378 = vrsqrt.f32 %v159_v14  ;;  %v267_v36 = vmax.f32 %v239_v46, 1e-24  ;;  %v2044_v2 = vsub.f32 %v2022_v55, %v290_v32  ;;  %v2076_v10 = vmul.f32 %v1357_v25, %v1673_v17 }
  0xc4   :  { %v266_v47 = vmax.f32 %v236_v18, 1e-24  ;;  %v1361_v6 = vpop.eup %1360  ;;  %1380 = vrsqrt.f32 %v158_v15  ;;  %v435_v7 = vadd.f32 %v2038_v0, %v2035_v63  ;;  %v293_v8 = vmul.f32 %v1359_v1, %v1764_v52 }
  0xc5   :  { %v2062_v11 = vpop.eup %1362  ;;  %1382 = vrsqrt.f32 %v267_v36  ;;  %v434_v43 = vadd.f32 %v2044_v2, %v2028_v24  ;;  %v292_v14 = vmul.f32 %v1361_v6, %v1769_v53  ;;  %3561 = vst [vmem:[#allocation15_spill] sm:$0xff] %v2076_v10  ;;  %v161_v1 = vmax.f32 %v2007_v61, 1e-24 }
  0xc6   :  { %v2070_v52 = vpop.eup %1364  ;;  %1384 = vrsqrt.f32 %v266_v47  ;;  %v245_v51 = vpop.xlane.xlu1 %244  ;;  %v451_v15 = vmul.f32 %v435_v7, %v435_v7  ;;  %v2073_v9 = vsub.f32 %v2049_v33, %v293_v8  ;;  %v2094_v47 = vld [vmem:[%s3527_s1 + $0x20] sm:$0xff] }
  0xc7   :  { %v242_v26 = vpop.xlane.xlu0 %241  ;;  %v1367_v54 = vpop.eup %1366  ;;  %v269_v32 = vmax.f32 %v245_v51, 1e-24  ;;  %v450_v18 = vmul.f32 %v434_v43, %v434_v43  ;;  %v2079_v53 = vsub.f32 %v2057_v19, %v292_v14  ;;  %3562 = vst [vmem:[#allocation16_spill] sm:$0xff] %v2094_v47 }
  0xc8   :  { %v268_v46 = vmax.f32 %v242_v26, 1e-24  ;;  %v1369_v62 = vpop.eup %1368  ;;  %v469_v36 = vsel %vm97_vm0, %v451_v15, 0.0  ;;  %v437_v17 = vadd.f32 %v2073_v9, %v2032_v44  ;;  %v295_v25 = vmul.f32 %v1367_v54, %v1780_v58 }
  0xc9   :  { %v2096_v6 = vpop.eup %1370  ;;  %1386 = vrsqrt.f32 %v269_v32  ;;  %470 = vadd.xlane.f32.xlu1 %v469_v36  ;;  %v466_v7 = vsel %vm97_vm0, %v450_v18, 0.0  ;;  %v436_v61 = vadd.f32 %v2079_v53, %v2025_v45  ;;  %v294_v8 = vmul.f32 %v1369_v62, %v1785_v59  ;;  %v2114_v59 = vld [vmem:[%s3527_s1 + $0x38] sm:$0xff] }
  0xca   :  { %v2102_v43 = vpop.eup %1372  ;;  %v160_v58 = vmax.f32 %v2009_v60, 1e-24  ;;  %1388 = vrsqrt.f32 %v268_v46  ;;  %467 = vadd.xlane.f32.xlu0 %v466_v7  ;;  %v251_v14 = vpop.xlane.xlu1 %250  ;;  %v453_v26 = vmul.f32 %v437_v17, %v437_v17  ;;  %v2106_v15 = vsub.f32 %v2084_v16, %v295_v25  ;;  %v2123_v25 = vld [vmem:[%s3527_s1 + $0x30] sm:$0xff] }
  0xcb   :  { %v248_v51 = vpop.xlane.xlu0 %247  ;;  %v1375_v54 = vpop.eup %1374  ;;  %v271_v32 = vmax.f32 %v251_v14, 1e-24  ;;  %v452_v36 = vmul.f32 %v436_v61, %v436_v61  ;;  %v2109_v45 = vsub.f32 %v2094_v47, %v294_v8  ;;  %1390 = vrsqrt.f32 %v161_v1 }
  0xcc   :  { %v270_v18 = vmax.f32 %v248_v51, 1e-24  ;;  %v1377_v60 = vpop.eup %1376  ;;  %v475_v46 = vsel %vm97_vm0, %v453_v26, 0.0  ;;  %v439_v62 = vadd.f32 %v2106_v15, %v2041_v27  ;;  %v297_v17 = vmul.f32 %v1375_v54, %v1796_v3 }
  0xcd   :  { %v2125_v7 = vpop.eup %1378  ;;  %1392 = vrsqrt.f32 %v271_v32  ;;  %476 = vadd.xlane.f32.xlu1 %v475_v46  ;;  %v472_v61 = vsel %vm97_vm0, %v452_v36, 0.0  ;;  %v438_v1 = vadd.f32 %v2109_v45, %v2060_v37  ;;  %v296_v8 = vmul.f32 %v1377_v60, %v1801_v4 }
  0xce   :  { %v2131_v14 = vpop.eup %1380  ;;  %1394 = vrsqrt.f32 %v270_v18  ;;  %473 = vadd.xlane.f32.xlu0 %v472_v61  ;;  %v257_v3 = vpop.xlane.xlu1 %256  ;;  %v455_v26 = vmul.f32 %v439_v62, %v439_v62  ;;  %v2134_v54 = vsub.f32 %v2114_v59, %v297_v17  ;;  %v2138_v32 = vmul.f32 %v2062_v11, %v1684_v22  ;;  %v2146_v18 = vld [vmem:[%s3527_s1 + $0x48] sm:$0xff]  ;;  %v2155_v17 = vld [vmem:[%s3527_s1 + $0x40] sm:$0xff] }
  0xcf   :  { %v254_v51 = vpop.xlane.xlu0 %253  ;;  %v1383_v36 = vpop.eup %1382  ;;  %v273_v46 = vmax.f32 %v257_v3, 1e-24  ;;  %v454_v37 = vmul.f32 %v438_v1, %v438_v1  ;;  %v2141_v4 = vsub.f32 %v2123_v25, %v296_v8  ;;  %1396 = vrsqrt.f32 %v160_v58 }
  0xd0   :  { %v272_v47 = vmax.f32 %v254_v51, 1e-24  ;;  %v1385_v60 = vpop.eup %1384  ;;  %v481_v62 = vsel %vm97_vm0, %v455_v26, 0.0  ;;  %v441_v22 = vadd.f32 %v2134_v54, %v2068_v50  ;;  %v299_v11 = vmul.f32 %v1383_v36, %v1812_v12 }
  0xd1   :  { %1398 = vrsqrt.f32 %v273_v46  ;;  %482 = vadd.xlane.f32.xlu1 %v481_v62  ;;  %v478_v61 = vsel %vm97_vm0, %v454_v37, 0.0  ;;  %v440_v1 = vadd.f32 %v2141_v4, %v2076_v10  ;;  %v298_v58 = vmul.f32 %v1385_v60, %v1817_v13  ;;  %v2174_v13 = vld [vmem:[%s3527_s1 + $0x58] sm:$0xff] }
  0xd2   :  { %1400 = vrsqrt.f32 %v272_v47  ;;  %479 = vadd.xlane.f32.xlu0 %v478_v61  ;;  %v327_v8 = vpop.xlane.xlu1 %326  ;;  %v457_v51 = vmul.f32 %v441_v22, %v441_v22  ;;  %v2162_v12 = vsub.f32 %v2146_v18, %v299_v11  ;;  %v2166_v26 = vmul.f32 %v2070_v52, %v1689_v23  ;;  %v2187_v11 = vld [vmem:[%s3527_s1 + $0x50] sm:$0xff] }
  0xd3   :  { %v324_v3 = vpop.xlane.xlu0 %323  ;;  %v1387_v36 = vpop.eup %1386  ;;  %v371_v46 = vmax.f32 %v327_v8, 1e-24  ;;  %v456_v62 = vmul.f32 %v440_v1, %v440_v1  ;;  %v2169_v10 = vsub.f32 %v2155_v17, %v298_v58  ;;  %v2181_v23 = vmul.f32 %v2096_v6, %v1700_v28 }
  0xd4   :  { %3563 = vst [vmem:[#allocation17_spill] sm:$0xff] %v2166_v26  ;;  %v370_v37 = vmax.f32 %v324_v3, 1e-24  ;;  %v1389_v47 = vpop.eup %1388  ;;  %v487_v60 = vsel %vm97_vm0, %v457_v51, 0.0  ;;  %v443_v22 = vadd.f32 %v2162_v12, %v2138_v32  ;;  %v301_v52 = vmul.f32 %v1387_v36, %v1828_v20 }
  0xd5   :  { %1402 = vrsqrt.f32 %v371_v46  ;;  %488 = vadd.xlane.f32.xlu1 %v487_v60  ;;  %v484_v61 = vsel %vm97_vm0, %v456_v62, 0.0  ;;  %v442_v1 = vadd.f32 %v2169_v10, %v2166_v26  ;;  %v300_v58 = vmul.f32 %v1389_v47, %v1833_v21  ;;  %v1391_v8 = vpop.eup %1390  ;;  %v2206_v21 = vld [vmem:[%s3527_s1 + $0x68] sm:$0xff] }
  0xd6   :  { %1404 = vrsqrt.f32 %v370_v37  ;;  %485 = vadd.xlane.f32.xlu0 %v484_v61  ;;  %v333_v28 = vpop.xlane.xlu1 %332  ;;  %v459_v20 = vmul.f32 %v443_v22, %v443_v22  ;;  %v2194_v3 = vsub.f32 %v2174_v13, %v301_v52  ;;  %v2198_v51 = vmul.f32 %v2102_v43, %v1705_v29  ;;  %v2219_v52 = vld [vmem:[%s3527_s1 + $0x60] sm:$0xff] }
  0xd7   :  { %v330_v6 = vpop.xlane.xlu0 %329  ;;  %v1393_v36 = vpop.eup %1392  ;;  %v373_v46 = vmax.f32 %v333_v28, 1e-24  ;;  %v458_v60 = vmul.f32 %v442_v1, %v442_v1  ;;  %v2201_v26 = vsub.f32 %v2187_v11, %v300_v58  ;;  %v2213_v29 = vmul.f32 %v2125_v7, %v1716_v34 }
  0xd8   :  { %3564 = vst [vmem:[#allocation18_spill] sm:$0xff] %v2198_v51  ;;  %v372_v62 = vmax.f32 %v330_v6, 1e-24  ;;  %v1395_v37 = vpop.eup %1394  ;;  %v493_v47 = vsel %vm97_vm0, %v459_v20, 0.0  ;;  %v445_v22 = vadd.f32 %v2194_v3, %v2181_v23  ;;  %v303_v43 = vmul.f32 %v1393_v36, %v1844_v30 }
  0xd9   :  { %1406 = vrsqrt.f32 %v373_v46  ;;  %494 = vadd.xlane.f32.xlu1 %v493_v47  ;;  %v490_v61 = vsel %vm97_vm0, %v458_v60, 0.0  ;;  %v444_v1 = vadd.f32 %v2201_v26, %v2198_v51  ;;  %v302_v58 = vmul.f32 %v1395_v37, %v1849_v31  ;;  %v1397_v28 = vpop.eup %1396  ;;  %v2238_v31 = vld [vmem:[%s3527_s1 + $0x78] sm:$0xff] }
  0xda   :  { %1408 = vrsqrt.f32 %v372_v62  ;;  %491 = vadd.xlane.f32.xlu0 %v490_v61  ;;  %v339_v34 = vpop.xlane.xlu1 %338  ;;  %v461_v30 = vmul.f32 %v445_v22, %v445_v22  ;;  %v2226_v6 = vsub.f32 %v2206_v21, %v303_v43  ;;  %v2230_v20 = vmul.f32 %v2131_v14, %v1721_v35  ;;  %v2250_v43 = vld [vmem:[%s3527_s1 + $0x70] sm:$0xff] }
  0xdb   :  { %v336_v7 = vpop.xlane.xlu0 %335  ;;  %v1399_v36 = vpop.eup %1398  ;;  %v375_v46 = vmax.f32 %v339_v34, 1e-24  ;;  %v460_v47 = vmul.f32 %v444_v1, %v444_v1  ;;  %v2233_v51 = vsub.f32 %v2219_v52, %v302_v58  ;;  %v2244_v35 = vmul.f32 %v1391_v8, %v1732_v40 }
  0xdc   :  { %3565 = vst [vmem:[#allocation19_spill] sm:$0xff] %v2230_v20  ;;  %v374_v60 = vmax.f32 %v336_v7, 1e-24  ;;  %v1401_v62 = vpop.eup %1400  ;;  %v499_v37 = vsel %vm97_vm0, %v461_v30, 0.0  ;;  %v447_v22 = vadd.f32 %v2226_v6, %v2213_v29  ;;  %v305_v14 = vmul.f32 %v1399_v36, %v1860_v38 }
  0xdd   :  { %1410 = vrsqrt.f32 %v375_v46  ;;  %500 = vadd.xlane.f32.xlu1 %v499_v37  ;;  %v496_v61 = vsel %vm97_vm0, %v460_v47, 0.0  ;;  %v446_v1 = vadd.f32 %v2233_v51, %v2230_v20  ;;  %v304_v58 = vmul.f32 %v1401_v62, %v1865_v39 }
  0xde   :  { %1412 = vrsqrt.f32 %v374_v60  ;;  %497 = vadd.xlane.f32.xlu0 %v496_v61  ;;  %v345_v40 = vpop.xlane.xlu1 %344  ;;  %v463_v34 = vmul.f32 %v447_v22, %v447_v22  ;;  %v2257_v38 = vsub.f32 %v2238_v31, %v305_v14  ;;  %v2260_v7 = vmul.f32 %v1397_v28, %v1737_v41 }
  0xdf   :  { %v342_v8 = vpop.xlane.xlu0 %341  ;;  %v1403_v30 = vpop.eup %1402  ;;  %v377_v36 = vmax.f32 %v345_v40, 1e-24  ;;  %v462_v47 = vmul.f32 %v446_v1, %v446_v1  ;;  %v2263_v37 = vsub.f32 %v2250_v43, %v304_v58 }
  0xe0   :  { %3566 = vst [vmem:[#allocation20_spill] sm:$0xff] %v2260_v7  ;;  %v376_v46 = vmax.f32 %v342_v8, 1e-24  ;;  %v1405_v20 = vpop.eup %1404  ;;  %v505_v39 = vsel %vm97_vm0, %v463_v34, 0.0  ;;  %v449_v60 = vadd.f32 %v2257_v38, %v2244_v35  ;;  %v403_v62 = vmul.f32 %v1403_v30, %v1876_v48 }
  0xe1   :  { %1414 = vrsqrt.f32 %v377_v36  ;;  %506 = vadd.xlane.f32.xlu1 %v505_v39  ;;  %v502_v41 = vsel %vm97_vm0, %v462_v47, 0.0  ;;  %v448_v28 = vadd.f32 %v2263_v37, %v2260_v7  ;;  %v402_v22 = vmul.f32 %v1405_v20, %v1881_v49 }
  0xe2   :  { %1416 = vrsqrt.f32 %v376_v46  ;;  %503 = vadd.xlane.f32.xlu0 %v502_v41  ;;  %v351_v14 = vpop.xlane.xlu1 %350  ;;  %v465_v1 = vmul.f32 %v449_v60, %v449_v60  ;;  %v643_v58 = vadd.f32 %v2038_v0, %v403_v62  ;;  %v851_v40 = vsub.f32 %v2014_v42, %v403_v62 }
  0xe3   :  { %v348_v61 = vpop.xlane.xlu0 %347  ;;  %v1407_v8 = vpop.eup %1406  ;;  %v379_v48 = vmax.f32 %v351_v14, 1e-24  ;;  %v464_v30 = vmul.f32 %v448_v28, %v448_v28  ;;  %v642_v36 = vadd.f32 %v2044_v2, %v402_v22 }
  0xe4   :  { %v378_v34 = vmax.f32 %v348_v61, 1e-24  ;;  %v1409_v47 = vpop.eup %1408  ;;  %v511_v39 = vsel %vm97_vm0, %v465_v1, 0.0  ;;  %v659_v7 = vmul.f32 %v643_v58, %v643_v58  ;;  %v405_v49 = vmul.f32 %v1407_v8, %v1892_v56 }
  0xe5   :  { %v2279_v20 = vadd.f32 %v851_v40, %v2035_v63  ;;  %1418 = vrsqrt.f32 %v379_v48  ;;  %512 = vadd.xlane.f32.xlu1 %v511_v39  ;;  %v508_v0 = vsel %vm97_vm0, %v464_v30, 0.0  ;;  %v658_v42 = vmul.f32 %v642_v36, %v642_v36  ;;  %v3567_v48 = vld [vmem:[#allocation2_spill] sm:$0xff] }
  0xe6   :  { %v404_v46 = vmul.f32 %v1409_v47, %v1897_v57  ;;  %1420 = vrsqrt.f32 %v378_v34  ;;  %509 = vadd.xlane.f32.xlu0 %v508_v0  ;;  %v357_v60 = vpop.xlane.xlu1 %356  ;;  %v645_v62 = vadd.f32 %v2073_v9, %v405_v49  ;;  %v677_v56 = vsel %vm97_vm0, %v659_v7, 0.0 }
  0xe7   :  { %v354_v2 = vpop.xlane.xlu0 %353  ;;  %v1411_v41 = vpop.eup %1410  ;;  %v381_v28 = vmax.f32 %v357_v60, 1e-24  ;;  %v674_v1 = vsel %vm97_vm0, %v658_v42, 0.0  ;;  %v850_v57 = vsub.f32 %v2022_v55, %v402_v22  ;;  %v853_v34 = vsub.f32 %v2049_v33, %v405_v49  ;;  %v3568_v49 = vld [vmem:[#allocation3_spill] sm:$0xff] }
  0xe8   :  { %v380_v14 = vmax.f32 %v354_v2, 1e-24  ;;  %v644_v63 = vadd.f32 %v2079_v53, %v404_v46  ;;  %v1413_v61 = vpop.eup %1412  ;;  %v661_v58 = vmul.f32 %v645_v62, %v645_v62  ;;  %v407_v40 = vmul.f32 %v1411_v41, %v1908_v5 }
  0xe9   :  { %1422 = vrsqrt.f32 %v381_v28  ;;  %678 = vadd.xlane.f32.xlu1 %v677_v56  ;;  %v406_v9 = vmul.f32 %v1413_v61, %v3567_v48  ;;  %v2293_v36 = vadd.f32 %v850_v57, %v2028_v24  ;;  %v2300_v2 = vadd.f32 %v853_v34, %v2032_v44  ;;  %v3570_v48 = vld [vmem:[#allocation5_spill] sm:$0xff] }
  0xea   :  { %v660_v8 = vmul.f32 %v644_v63, %v644_v63  ;;  %1424 = vrsqrt.f32 %v380_v14  ;;  %675 = vadd.xlane.f32.xlu0 %v674_v1  ;;  %v363_v7 = vpop.xlane.xlu1 %362  ;;  %v647_v53 = vadd.f32 %v2106_v15, %v407_v40  ;;  %v683_v55 = vsel %vm97_vm0, %v661_v58, 0.0  ;;  %v3569_v15 = vld [vmem:[#allocation4_spill] sm:$0xff] }
  0xeb   :  { %v360_v30 = vpop.xlane.xlu0 %359  ;;  %v1415_v47 = vpop.eup %1414  ;;  %v383_v5 = vmax.f32 %v363_v7, 1e-24  ;;  %v646_v22 = vadd.f32 %v2109_v45, %v406_v9  ;;  %v852_v41 = vsub.f32 %v2057_v19, %v404_v46  ;;  %v3571_v19 = vld [vmem:[#allocation13_spill] sm:$0xff] }
  0xec   :  { %v382_v39 = vmax.f32 %v360_v30, 1e-24  ;;  %v1417_v0 = vpop.eup %1416  ;;  %v680_v42 = vsel %vm97_vm0, %v660_v8, 0.0  ;;  %v663_v33 = vmul.f32 %v647_v53, %v647_v53  ;;  %v409_v60 = vmul.f32 %v1415_v47, %v3568_v49  ;;  %v3574_v49 = vld [vmem:[#allocation16_spill] sm:$0xff] }
  0xed   :  { %1426 = vrsqrt.f32 %v383_v5  ;;  %684 = vadd.xlane.f32.xlu1 %v683_v55  ;;  %v662_v24 = vmul.f32 %v646_v22, %v646_v22  ;;  %v408_v62 = vmul.f32 %v1417_v0, %v3569_v15  ;;  %v2310_v46 = vadd.f32 %v852_v41, %v3571_v19  ;;  %v3575_v15 = vld [vmem:[#allocation8_spill] sm:$0xff] }
  0xee   :  { %1428 = vrsqrt.f32 %v382_v39  ;;  %681 = vadd.xlane.f32.xlu0 %v680_v42  ;;  %v369_v28 = vpop.xlane.xlu1 %368  ;;  %v649_v14 = vadd.f32 %v2134_v54, %v409_v60  ;;  %v689_v1 = vsel %vm97_vm0, %v663_v33, 0.0  ;;  %v3572_v54 = vld [vmem:[#allocation6_spill] sm:$0xff]  ;;  %v855_v53 = vsub.f32 %v2084_v16, %v407_v40  ;;  %v3573_v42 = vld [vmem:[#allocation7_spill] sm:$0xff] }
  0xef   :  { %v366_v45 = vpop.xlane.xlu0 %365  ;;  %v1419_v56 = vpop.eup %1418  ;;  %v385_v63 = vmax.f32 %v369_v28, 1e-24  ;;  %v648_v44 = vadd.f32 %v2141_v4, %v408_v62  ;;  %v686_v57 = vsel %vm97_vm0, %v662_v24, 0.0  ;;  %v854_v24 = vsub.f32 %v3574_v49, %v406_v9  ;;  %v3576_v28 = vld [vmem:[#allocation14_spill] sm:$0xff] }
  0xf0   :  { %v384_v61 = vmax.f32 %v366_v45, 1e-24  ;;  %v1421_v58 = vpop.eup %1420  ;;  %v665_v8 = vmul.f32 %v649_v14, %v649_v14  ;;  %v411_v34 = vmul.f32 %v1419_v56, %v3570_v48  ;;  %v2318_v55 = vadd.f32 %v855_v53, %v2041_v27 }
  0xf1   :  { %1430 = vrsqrt.f32 %v385_v63  ;;  %690 = vadd.xlane.f32.xlu1 %v689_v1  ;;  %v664_v7 = vmul.f32 %v648_v44, %v648_v44  ;;  %v410_v30 = vmul.f32 %v1421_v58, %v3572_v54  ;;  %v857_v16 = vsub.f32 %v2114_v59, %v409_v60  ;;  %v3577_v1 = vld [vmem:[#allocation9_spill] sm:$0xff]  ;;  %v3578_v58 = vld [vmem:[#allocation10_spill] sm:$0xff] }
  0xf2   :  { %1432 = vrsqrt.f32 %v384_v61  ;;  %687 = vadd.xlane.f32.xlu0 %v686_v57  ;;  %v651_v4 = vadd.f32 %v2162_v12, %v411_v34  ;;  %v695_v5 = vsel %vm97_vm0, %v665_v8, 0.0  ;;  %v2327_v27 = vadd.f32 %v854_v24, %v3576_v28  ;;  %v3579_v8 = vld [vmem:[#allocation15_spill] sm:$0xff] }
  0xf3   :  { %v1423_v47 = vpop.eup %1422  ;;  %v650_v39 = vadd.f32 %v2169_v10, %v410_v30  ;;  %v692_v40 = vsel %vm97_vm0, %v664_v7, 0.0  ;;  %v2330_v45 = vadd.f32 %v857_v16, %v2068_v50  ;;  %v856_v59 = vsub.f32 %v2123_v25, %v408_v62 }
  0xf4   :  { %v1425_v22 = vpop.eup %1424  ;;  %v667_v0 = vmul.f32 %v651_v4, %v651_v4  ;;  %v413_v33 = vmul.f32 %v1423_v47, %v3573_v42  ;;  %v859_v48 = vsub.f32 %v2146_v18, %v411_v34  ;;  %v3580_v4 = vld [vmem:[#allocation11_spill] sm:$0xff] }
  0xf5   :  { %696 = vadd.xlane.f32.xlu1 %v695_v5  ;;  %v666_v12 = vmul.f32 %v650_v39, %v650_v39  ;;  %v412_v41 = vmul.f32 %v1425_v22, %v3575_v15  ;;  %v872_v50 = vadd.f32 %v856_v59, %v3579_v8  ;;  %v858_v5 = vsub.f32 %v2155_v17, %v410_v30 }
  0xf6   :  { %693 = vadd.xlane.f32.xlu0 %v692_v40  ;;  %v653_v10 = vadd.f32 %v2194_v3, %v413_v33  ;;  %v701_v56 = vsel %vm97_vm0, %v667_v0, 0.0  ;;  %v875_v7 = vadd.f32 %v859_v48, %v2138_v32  ;;  %v861_v39 = vsub.f32 %v2174_v13, %v413_v33  ;;  %v3583_v40 = vld [vmem:[#allocation18_spill] sm:$0xff] }
  0xf7   :  { %v1427_v14 = vpop.eup %1426  ;;  %v652_v9 = vadd.f32 %v2201_v26, %v412_v41  ;;  %v698_v63 = vsel %vm97_vm0, %v666_v12, 0.0  ;;  %v860_v24 = vsub.f32 %v2187_v11, %v412_v41 }
  0xf8   :  { %v1429_v60 = vpop.eup %1428  ;;  %v669_v61 = vmul.f32 %v653_v10, %v653_v10  ;;  %v415_v44 = vmul.f32 %v1427_v14, %v3577_v1  ;;  %v877_v32 = vadd.f32 %v861_v39, %v2181_v23 }
  0xf9   :  { %702 = vadd.xlane.f32.xlu1 %v701_v56  ;;  %v668_v3 = vmul.f32 %v652_v9, %v652_v9  ;;  %v414_v57 = vmul.f32 %v1429_v60, %v3578_v58  ;;  %v876_v12 = vadd.f32 %v860_v24, %v3583_v40  ;;  %v886_v56 = vmul.f32 %v2327_v27, %v2327_v27 }
  0xfa   :  { %699 = vadd.xlane.f32.xlu0 %v698_v63  ;;  %v655_v26 = vadd.f32 %v2226_v6, %v415_v44  ;;  %v707_v62 = vsel %vm97_vm0, %v669_v61, 0.0  ;;  %v3581_v6 = vld [vmem:[#allocation12_spill] sm:$0xff]  ;;  %v863_v33 = vsub.f32 %v2206_v21, %v415_v44  ;;  %v883_v21 = vmul.f32 %v2279_v20, %v2279_v20 }
  0xfb   :  { %v1431_v25 = vpop.eup %1430  ;;  %v654_v19 = vadd.f32 %v2233_v51, %v414_v57  ;;  %v704_v18 = vsel %vm97_vm0, %v668_v3, 0.0  ;;  %v3582_v51 = vld [vmem:[#allocation17_spill] sm:$0xff]  ;;  %v889_v63 = vmul.f32 %v2330_v45, %v2330_v45  ;;  %v888_v61 = vmul.f32 %v872_v50, %v872_v50 }
  0xfc   :  { %v1433_v54 = vpop.eup %1432  ;;  %v671_v53 = vmul.f32 %v655_v26, %v655_v26  ;;  %v417_v47 = vmul.f32 %v1431_v25, %v3580_v4  ;;  %v874_v42 = vadd.f32 %v858_v5, %v3582_v51  ;;  %v879_v23 = vadd.f32 %v863_v33, %v2213_v29  ;;  %v1562_v25 = vld [vmem:[%s3524_s0 + $0x8] sm:$0xff]  ;;  %v1568_v51 = vld [vmem:[%s3524_s0 + $0x10] sm:$0xff] }
  0xfd   :  { %708 = vadd.xlane.f32.xlu1 %v707_v62  ;;  %v670_v34 = vmul.f32 %v654_v19, %v654_v19  ;;  %v416_v22 = vmul.f32 %v1433_v54, %v3581_v6  ;;  %v901_v9 = vsel %vm97_vm0, %v883_v21, 0.0  ;;  %v919_v1 = vsel %vm97_vm0, %v889_v63, 0.0  ;;  %v1563_v62 = vld [vmem:[%s3525_s2 + $0x8] sm:$0xff]  ;;  %v1565_v54 = vld [vmem:[%s3525_s2] sm:$0xff]  ;;  %v1567_v6 = vld [vmem:[%s3525_s2 + $0x18] sm:$0xff] }
  0xfe   :  { %705 = vadd.xlane.f32.xlu0 %v704_v18  ;;  %v657_v0 = vadd.f32 %v2257_v38, %v417_v47  ;;  %v713_v17 = vsel %vm97_vm0, %v671_v53, 0.0  ;;  %v862_v38 = vsub.f32 %v2219_v52, %v414_v57  ;;  %v865_v15 = vsub.f32 %v2238_v31, %v417_v47  ;;  %v3585_v31 = vld [vmem:[#allocation20_spill] sm:$0xff]  ;;  %v1571_v33 = vld [vmem:[%s3525_s2 + $0x28] sm:$0xff] }
  0xff   :  { %v656_v49 = vadd.f32 %v2263_v37, %v416_v22  ;;  %v710_v13 = vsel %vm97_vm0, %v670_v34, 0.0  ;;  %v3584_v37 = vld [vmem:[#allocation19_spill] sm:$0xff]  ;;  %v864_v28 = vsub.f32 %v2250_v43, %v416_v22  ;;  %v882_v52 = vmul.f32 %v2293_v36, %v2293_v36  ;;  %v1566_v34 = vld [vmem:[%s3524_s0 + $0x18] sm:$0xff] }
 0x100   :  { %v673_v30 = vmul.f32 %v657_v0, %v657_v0  ;;  %v878_v11 = vadd.f32 %v862_v38, %v3584_v37  ;;  %v881_v41 = vadd.f32 %v865_v15, %v2244_v35  ;;  %v885_v35 = vmul.f32 %v2300_v2, %v2300_v2  ;;  %v1572_v38 = vld [vmem:[%s3524_s0 + $0x20] sm:$0xff] }
 0x101   :  { %714 = vadd.xlane.f32.xlu1 %v713_v17  ;;  %v672_v16 = vmul.f32 %v656_v49, %v656_v49  ;;  %v880_v29 = vadd.f32 %v864_v28, %v3585_v31  ;;  %v898_v59 = vsel %vm97_vm0, %v882_v52, 0.0  ;;  %v884_v43 = vmul.f32 %v2310_v46, %v2310_v46  ;;  %v1573_v15 = vld [vmem:[%s3525_s2 + $0x20] sm:$0xff]  ;;  %v1576_v52 = vld [vmem:[%s3524_s0 + $0x30] sm:$0xff] }
 0x102   :  { %711 = vadd.xlane.f32.xlu0 %v710_v13  ;;  %v719_v10 = vsel %vm97_vm0, %v673_v30, 0.0  ;;  %v907_v20 = vsel %vm97_vm0, %v885_v35, 0.0  ;;  %v887_v36 = vmul.f32 %v2318_v55, %v2318_v55  ;;  %v910_v46 = vsel %vm97_vm0, %v886_v56, 0.0  ;;  %v1570_v30 = vld [vmem:[%s3524_s0 + $0x28] sm:$0xff]  ;;  %v1577_v31 = vld [vmem:[%s3525_s2 + $0x30] sm:$0xff]  ;;  %v1580_v56 = vld [vmem:[%s3524_s0 + $0x40] sm:$0xff] }
 0x103   :  { %v716_v14 = vsel %vm97_vm0, %v672_v16, 0.0  ;;  %v904_v60 = vsel %vm97_vm0, %v884_v43, 0.0  ;;  %v891_v55 = vmul.f32 %v875_v7, %v875_v7  ;;  %v916_v44 = vsel %vm97_vm0, %v888_v61, 0.0  ;;  %v1564_v7 = vld [vmem:[%s3524_s0] sm:$0xff]  ;;  %v1579_v43 = vld [vmem:[%s3525_s2 + $0x48] sm:$0xff] }
 0x104   :  { %v913_v2 = vsel %vm97_vm0, %v887_v36, 0.0  ;;  %v890_v3 = vmul.f32 %v874_v42, %v874_v42  ;;  %v893_v58 = vmul.f32 %v877_v32, %v877_v32  ;;  %v892_v45 = vmul.f32 %v876_v12, %v876_v12  ;;  %v1569_v42 = vld [vmem:[%s3525_s2 + $0x10] sm:$0xff] }
 0x105   :  { %720 = vadd.xlane.f32.xlu1 %v719_v10  ;;  %v925_v27 = vsel %vm97_vm0, %v891_v55, 0.0  ;;  %v895_v50 = vmul.f32 %v879_v23, %v879_v23  ;;  %v894_v26 = vmul.f32 %v878_v11, %v878_v11  ;;  %v1075_v19 = vsub.f32 %v1562_v25, %v1563_v62  ;;  %v1575_v10 = vld [vmem:[%s3525_s2 + $0x38] sm:$0xff] }
 0x106   :  { %717 = vadd.xlane.f32.xlu0 %v716_v14  ;;  %v922_v57 = vsel %vm97_vm0, %v890_v3, 0.0  ;;  %v931_v8 = vsel %vm97_vm0, %v893_v58, 0.0  ;;  %v928_v48 = vsel %vm97_vm0, %v892_v45, 0.0  ;;  %v1074_v53 = vsub.f32 %v1564_v7, %v1565_v54  ;;  %v1583_v55 = vld [vmem:[%s3525_s2 + $0x58] sm:$0xff]  ;;  %v1584_v58 = vld [vmem:[%s3524_s0 + $0x50] sm:$0xff]  ;;  %v1588_v7 = vld [vmem:[%s3524_s0 + $0x60] sm:$0xff] }
 0x107   :  { %v937_v4 = vsel %vm97_vm0, %v895_v50, 0.0  ;;  %v897_v47 = vmul.f32 %v881_v41, %v881_v41  ;;  %v934_v5 = vsel %vm97_vm0, %v894_v26, 0.0  ;;  %v896_v39 = vmul.f32 %v880_v29, %v880_v29  ;;  %v1574_v41 = vld [vmem:[%s3524_s0 + $0x38] sm:$0xff]  ;;  %v1587_v26 = vld [vmem:[%s3525_s2 + $0x68] sm:$0xff]  ;;  %v1589_v54 = vld [vmem:[%s3525_s2 + $0x60] sm:$0xff] }
 0x108   :  { %v1091_v18 = vmul.f32 %v1075_v19, %v1075_v19  ;;  %v1077_v22 = vsub.f32 %v1566_v34, %v1567_v6  ;;  %v1090_v0 = vmul.f32 %v1074_v53, %v1074_v53  ;;  %v1076_v32 = vsub.f32 %v1568_v51, %v1569_v42 }
 0x109   :  { %902 = vadd.xlane.f32.xlu1 %v901_v9  ;;  %v943_v49 = vsel %vm97_vm0, %v897_v47, 0.0  ;;  %v940_v24 = vsel %vm97_vm0, %v896_v39, 0.0  ;;  %v1079_v16 = vsub.f32 %v1570_v30, %v1571_v33  ;;  %v1078_v23 = vsub.f32 %v1572_v38, %v1573_v15  ;;  %v1591_v39 = vld [vmem:[%s3525_s2 + $0x78] sm:$0xff] }
 0x10a   :  { %899 = vadd.xlane.f32.xlu0 %v898_v59  ;;  %v1109_v17 = vsel %vm97_vm0, %v1091_v18, 0.0  ;;  %v1093_v13 = vmul.f32 %v1077_v22, %v1077_v22  ;;  %v1106_v40 = vsel %vm97_vm0, %v1090_v0, 0.0  ;;  %v1092_v12 = vmul.f32 %v1076_v32, %v1076_v32  ;;  %v1578_v59 = vld [vmem:[%s3524_s0 + $0x48] sm:$0xff]  ;;  %v1592_v22 = vld [vmem:[%s3524_s0 + $0x70] sm:$0xff] }
 0x10b   :  { %v1095_v11 = vmul.f32 %v1079_v16, %v1079_v16  ;;  %v1081_v21 = vsub.f32 %v1574_v41, %v1575_v10  ;;  %v1094_v14 = vmul.f32 %v1078_v23, %v1078_v23  ;;  %v1080_v29 = vsub.f32 %v1576_v52, %v1577_v31  ;;  %v1593_v0 = vld [vmem:[%s3525_s2 + $0x70] sm:$0xff] }
 0x10c   :  { %v1115_v37 = vsel %vm97_vm0, %v1093_v13, 0.0  ;;  %v1112_v28 = vsel %vm97_vm0, %v1092_v12, 0.0  ;;  %v1086_v53 = vsub.f32 %v1588_v7, %v1589_v54  ;;  %v1088_v51 = vsub.f32 %v1592_v22, %v1593_v0 }
 0x10d   :  { %908 = vadd.xlane.f32.xlu1 %v907_v20  ;;  %v1121_v9 = vsel %vm97_vm0, %v1095_v11, 0.0  ;;  %v1097_v35 = vmul.f32 %v1081_v21, %v1081_v21  ;;  %v1083_v20 = vsub.f32 %v1578_v59, %v1579_v43  ;;  %v1118_v36 = vsel %vm97_vm0, %v1094_v14, 0.0 }
 0x10e   :  { %905 = vadd.xlane.f32.xlu0 %v904_v60  ;;  %v1096_v60 = vmul.f32 %v1080_v29, %v1080_v29  ;;  %v1102_v6 = vmul.f32 %v1086_v53, %v1086_v53 }
 0x10f   :  { %v1099_v61 = vmul.f32 %v1083_v20, %v1083_v20 }
 0x110   :  { %v1124_v3 = vsel %vm97_vm0, %v1096_v60, 0.0 }
 0x111   :  { %914 = vadd.xlane.f32.xlu1 %v913_v2  ;;  %v1581_v2 = vld [vmem:[%s3525_s2 + $0x40] sm:$0xff] }
 0x112   :  { %911 = vadd.xlane.f32.xlu0 %v910_v46  ;;  %v1082_v63 = vsub.f32 %v1580_v56, %v1581_v2  ;;  %v1127_v46 = vsel %vm97_vm0, %v1097_v35, 0.0 }
 0x115   :  { %920 = vadd.xlane.f32.xlu1 %v919_v1  ;;  %v1582_v1 = vld [vmem:[%s3524_s0 + $0x58] sm:$0xff] }
 0x116   :  { %917 = vadd.xlane.f32.xlu0 %v916_v44  ;;  %v1085_v44 = vsub.f32 %v1582_v1, %v1583_v55 }
 0x118   :  { %v1101_v50 = vmul.f32 %v1085_v44, %v1085_v44 }
 0x119   :  { %926 = vadd.xlane.f32.xlu1 %v925_v27  ;;  %v1098_v27 = vmul.f32 %v1082_v63, %v1082_v63 }
 0x11a   :  { %923 = vadd.xlane.f32.xlu0 %v922_v57  ;;  %v1585_v57 = vld [vmem:[%s3525_s2 + $0x50] sm:$0xff] }
 0x11b   :  { %v1084_v45 = vsub.f32 %v1584_v58, %v1585_v57  ;;  %v1130_v62 = vsel %vm97_vm0, %v1098_v27, 0.0 }
 0x11d   :  { %932 = vadd.xlane.f32.xlu1 %v931_v8  ;;  %v1133_v8 = vsel %vm97_vm0, %v1099_v61, 0.0  ;;  %v1100_v19 = vmul.f32 %v1084_v45, %v1084_v45 }
 0x11e   :  { %929 = vadd.xlane.f32.xlu0 %v928_v48  ;;  %v1586_v48 = vld [vmem:[%s3524_s0 + $0x68] sm:$0xff] }
 0x11f   :  { %v1087_v25 = vsub.f32 %v1586_v48, %v1587_v26  ;;  %v1136_v34 = vsel %vm97_vm0, %v1100_v19, 0.0 }
 0x121   :  { %938 = vadd.xlane.f32.xlu1 %v937_v4  ;;  %v1139_v4 = vsel %vm97_vm0, %v1101_v50, 0.0  ;;  %v1103_v47 = vmul.f32 %v1087_v25, %v1087_v25 }
 0x122   :  { %935 = vadd.xlane.f32.xlu0 %v934_v5  ;;  %v1590_v5 = vld [vmem:[%s3524_s0 + $0x78] sm:$0xff] }
 0x123   :  { %v1089_v18 = vsub.f32 %v1590_v5, %v1591_v39  ;;  %v1145_v42 = vsel %vm97_vm0, %v1103_v47, 0.0 }
 0x125   :  { %944 = vadd.xlane.f32.xlu1 %v943_v49  ;;  %v1105_v32 = vmul.f32 %v1089_v18, %v1089_v18  ;;  %v1142_v49 = vsel %vm97_vm0, %v1102_v6, 0.0 }
 0x126   :  { %941 = vadd.xlane.f32.xlu0 %v940_v24  ;;  %v1104_v24 = vmul.f32 %v1088_v51, %v1088_v51 }
 0x128   :  { %v1148_v13 = vsel %vm97_vm0, %v1104_v24, 0.0 }
 0x129   :  { %1110 = vadd.xlane.f32.xlu1 %v1109_v17  ;;  %v1151_v17 = vsel %vm97_vm0, %v1105_v32, 0.0 }
 0x12a   :  { %1107 = vadd.xlane.f32.xlu0 %v1106_v40 }
 0x12d   :  { %1116 = vadd.xlane.f32.xlu1 %v1115_v37 }
 0x12e   :  { %1113 = vadd.xlane.f32.xlu0 %v1112_v28 }
 0x131   :  { %1122 = vadd.xlane.f32.xlu1 %v1121_v9 }
 0x132   :  { %1119 = vadd.xlane.f32.xlu0 %v1118_v36 }
 0x135   :  { %1128 = vadd.xlane.f32.xlu1 %v1127_v46 }
 0x136   :  { %1125 = vadd.xlane.f32.xlu0 %v1124_v3 }
 0x139   :  { %1134 = vadd.xlane.f32.xlu1 %v1133_v8 }
 0x13a   :  { %1131 = vadd.xlane.f32.xlu0 %v1130_v62 }
 0x13d   :  { %1140 = vadd.xlane.f32.xlu1 %v1139_v4 }
 0x13e   :  { %1137 = vadd.xlane.f32.xlu0 %v1136_v34 }
 0x141   :  { %1146 = vadd.xlane.f32.xlu1 %v1145_v42 }
 0x142   :  { %1143 = vadd.xlane.f32.xlu0 %v1142_v49 }
 0x145   :  { %1152 = vadd.xlane.f32.xlu1 %v1151_v17 }
 0x146   :  { %1149 = vadd.xlane.f32.xlu0 %v1148_v13 }
 0x156   :  { %v471_v30 = vpop.xlane.xlu1 %470 }
 0x157   :  { %v468_v33 = vpop.xlane.xlu0 %467  ;;  %1434 = vrsqrt.f32 %v471_v30  ;;  %vm523_vm1 = vcmp.eq.f32.partialorder %v471_v30, inf  ;;  %vm525_vm2 = vcmp.eq.f32.partialorder %v471_v30, 0.0  ;;  %v526_v52 = vand.u32 2147483648, %v471_v30 }
 0x158   :  { %1436 = vrsqrt.f32 %v468_v33  ;;  %vm516_vm3 = vcmp.eq.f32.partialorder %v468_v33, inf  ;;  %vm518_vm4 = vcmp.eq.f32.partialorder %v468_v33, 0.0  ;;  %v519_v29 = vand.u32 2147483648, %v468_v33 }
 0x15a   :  { %v2509_v16 = vpop.xlane.xlu1 %476 }
 0x15b   :  { %v2511_v40 = vpop.xlane.xlu0 %473  ;;  %1438 = vrsqrt.f32 %v2509_v16  ;;  %vm537_vm5 = vcmp.eq.f32.partialorder %v2509_v16, inf  ;;  %vm539_vm6 = vcmp.eq.f32.partialorder %v2509_v16, 0.0  ;;  %v540_v35 = vand.u32 2147483648, %v2509_v16 }
 0x15c   :  { %1440 = vrsqrt.f32 %v2511_v40  ;;  %vm530_vm7 = vcmp.eq.f32.partialorder %v2511_v40, inf  ;;  %vm532_vm8 = vcmp.eq.f32.partialorder %v2511_v40, 0.0  ;;  %v533_v2 = vand.u32 2147483648, %v2511_v40 }
 0x15e   :  { %v2515_v12 = vpop.xlane.xlu1 %482 }
 0x15f   :  { %1442 = vrsqrt.f32 %v2515_v12  ;;  %v2518_v38 = vpop.xlane.xlu0 %479  ;;  %vm551_vm9 = vcmp.eq.f32.partialorder %v2515_v12, inf  ;;  %vm553_vm10 = vcmp.eq.f32.partialorder %v2515_v12, 0.0  ;;  %v554_v46 = vand.u32 2147483648, %v2515_v12 }
 0x160   :  { %1444 = vrsqrt.f32 %v2518_v38  ;;  %vm544_vm11 = vcmp.eq.f32.partialorder %v2518_v38, inf  ;;  %vm546_vm12 = vcmp.eq.f32.partialorder %v2518_v38, 0.0  ;;  %v547_v57 = vand.u32 2147483648, %v2518_v38 }
 0x161   :  { %v1435_v15 = vpop.eup %1434 }
 0x162   :  { %v2521_v23 = vpop.xlane.xlu1 %488  ;;  %v1437_v37 = vpop.eup %1436  ;;  %v522_v10 = vmul.f32 %v1435_v15, %v471_v30 }
 0x163   :  { %v2523_v11 = vpop.xlane.xlu0 %485  ;;  %1446 = vrsqrt.f32 %v2521_v23  ;;  %v515_v21 = vmul.f32 %v1437_v37, %v468_v33  ;;  %vm565_vm13 = vcmp.eq.f32.partialorder %v2521_v23, inf  ;;  %v568_v50 = vand.u32 2147483648, %v2521_v23 }
 0x164   :  { %1448 = vrsqrt.f32 %v2523_v11  ;;  %v524_v43 = vsel %vm523_vm1, %v471_v30, %v522_v10  ;;  %vm558_vm14 = vcmp.eq.f32.partialorder %v2523_v11, inf  ;;  %vm567_vm15 = vcmp.eq.f32.partialorder %v2521_v23, 0.0 }
 0x165   :  { %v1439_v41 = vpop.eup %1438  ;;  %v517_v20 = vsel %vm516_vm3, %v468_v33, %v515_v21  ;;  %v2552_v61 = vsel %vm525_vm2, %v526_v52, %v524_v43  ;;  %v561_v62 = vand.u32 2147483648, %v2523_v11  ;;  %vm560_vm1 = vcmp.eq.f32.partialorder %v2523_v11, 0.0 }
 0x166   :  { %v2527_v28 = vpop.xlane.xlu1 %494  ;;  %v1441_v14 = vpop.eup %1440  ;;  %v536_v36 = vmul.f32 %v1439_v41, %v2509_v16  ;;  %v2555_v1 = vsel %vm518_vm4, %v519_v29, %v517_v20  ;;  %v627_v26 = vsub.f32 0.0, %v2552_v61 }
 0x167   :  { %1450 = vrsqrt.f32 %v2527_v28  ;;  %v2530_v31 = vpop.xlane.xlu0 %491  ;;  %v529_v60 = vmul.f32 %v1441_v14, %v2511_v40  ;;  %v626_v25 = vsub.f32 0.0, %v2555_v1  ;;  %vm579_vm0 = vcmp.eq.f32.partialorder %v2527_v28, inf }
 0x168   :  { %1452 = vrsqrt.f32 %v2530_v31  ;;  %v538_v27 = vsel %vm537_vm5, %v2509_v16, %v536_v36  ;;  %vm581_vm2 = vcmp.eq.f32.partialorder %v2527_v28, 0.0  ;;  %v582_v6 = vand.u32 2147483648, %v2527_v28 }
 0x169   :  { %v1443_v9 = vpop.eup %1442  ;;  %v531_v58 = vsel %vm530_vm7, %v2511_v40, %v529_v60  ;;  %v2582_v7 = vsel %vm539_vm6, %v540_v35, %v538_v27  ;;  %vm572_vm3 = vcmp.eq.f32.partialorder %v2530_v31, inf  ;;  %vm574_vm4 = vcmp.eq.f32.partialorder %v2530_v31, 0.0 }
 0x16a   :  { %v1445_v59 = vpop.eup %1444  ;;  %v2539_v56 = vpop.xlane.xlu1 %500  ;;  %v550_v55 = vmul.f32 %v1443_v9, %v2515_v12  ;;  %v2586_v54 = vsel %vm532_vm8, %v533_v2, %v531_v58  ;;  %v629_v51 = vsub.f32 0.0, %v2582_v7  ;;  %v575_v32 = vand.u32 2147483648, %v2530_v31 }
 0x16b   :  { %1454 = vrsqrt.f32 %v2539_v56  ;;  %v2545_v63 = vpop.xlane.xlu0 %497  ;;  %v543_v44 = vmul.f32 %v1445_v59, %v2518_v38  ;;  %v628_v42 = vsub.f32 0.0, %v2586_v54  ;;  %vm593_vm5 = vcmp.eq.f32.partialorder %v2539_v56, inf }
 0x16c   :  { %1456 = vrsqrt.f32 %v2545_v63  ;;  %v552_v53 = vsel %vm551_vm9, %v2515_v12, %v550_v55  ;;  %vm595_vm6 = vcmp.eq.f32.partialorder %v2539_v56, 0.0  ;;  %v596_v13 = vand.u32 2147483648, %v2539_v56 }
 0x16d   :  { %v1447_v3 = vpop.eup %1446  ;;  %v545_v4 = vsel %vm544_vm11, %v2518_v38, %v543_v44  ;;  %v2614_v24 = vsel %vm553_vm10, %v554_v46, %v552_v53  ;;  %vm586_vm7 = vcmp.eq.f32.partialorder %v2545_v63, inf  ;;  %vm588_vm8 = vcmp.eq.f32.partialorder %v2545_v63, 0.0 }
 0x16e   :  { %v2567_v45 = vpop.xlane.xlu1 %506  ;;  %v1449_v8 = vpop.eup %1448  ;;  %v564_v5 = vmul.f32 %v1447_v3, %v2521_v23  ;;  %v2618_v17 = vsel %vm546_vm12, %v547_v57, %v545_v4  ;;  %v631_v10 = vsub.f32 0.0, %v2614_v24  ;;  %v589_v21 = vand.u32 2147483648, %v2545_v63 }
 0x16f   :  { %1458 = vrsqrt.f32 %v2567_v45  ;;  %v2573_v48 = vpop.xlane.xlu0 %503  ;;  %v557_v39 = vmul.f32 %v1449_v8, %v2523_v11  ;;  %v630_v52 = vsub.f32 0.0, %v2618_v17  ;;  %vm607_vm9 = vcmp.eq.f32.partialorder %v2567_v45, inf }
 0x170   :  { %1460 = vrsqrt.f32 %v2573_v48  ;;  %v566_v33 = vsel %vm565_vm13, %v2521_v23, %v564_v5  ;;  %vm609_vm10 = vcmp.eq.f32.partialorder %v2567_v45, 0.0  ;;  %v610_v23 = vand.u32 2147483648, %v2567_v45 }
 0x171   :  { %v1451_v19 = vpop.eup %1450  ;;  %v559_v16 = vsel %vm558_vm14, %v2523_v11, %v557_v39  ;;  %v2650_v29 = vsel %vm567_vm15, %v568_v50, %v566_v33  ;;  %vm600_vm11 = vcmp.eq.f32.partialorder %v2573_v48, inf  ;;  %v603_v2 = vand.u32 2147483648, %v2573_v48 }
 0x172   :  { %v1453_v47 = vpop.eup %1452  ;;  %v578_v18 = vmul.f32 %v1451_v19, %v2527_v28  ;;  %v2600_v34 = vpop.xlane.xlu1 %512  ;;  %v2656_v9 = vsel %vm560_vm1, %v561_v62, %v559_v16  ;;  %v633_v60 = vsub.f32 0.0, %v2650_v29  ;;  %vm1266_vm12 = vcmask 7168  }
 0x173   :  { %v571_v22 = vmul.f32 %v1453_v47, %v2530_v31  ;;  %v2606_v0 = vpop.xlane.xlu0 %509  ;;  %1462 = vrsqrt.f32 %v2600_v34  ;;  %v632_v46 = vsub.f32 0.0, %v2656_v9  ;;  %v624_v44 = vand.u32 2147483648, %v2600_v34 }
 0x174   :  { %v580_v40 = vsel %vm579_vm0, %v2527_v28, %v578_v18  ;;  %v617_v57 = vand.u32 2147483648, %v2606_v0 }
 0x175   :  { %v1455_v49 = vpop.eup %1454  ;;  %v573_v38 = vsel %vm572_vm3, %v2530_v31, %v571_v22  ;;  %v2660_v35 = vsel %vm581_vm2, %v582_v6, %v580_v40 }
 0x176   :  { %v1457_v30 = vpop.eup %1456  ;;  %v2633_v12 = vpop.xlane.xlu1 %678  ;;  %v592_v15 = vmul.f32 %v1455_v49, %v2539_v56  ;;  %v2664_v59 = vsel %vm574_vm4, %v575_v32, %v573_v38  ;;  %v635_v55 = vsub.f32 0.0, %v2660_v35 }
 0x177   :  { %v585_v37 = vmul.f32 %v1457_v30, %v2545_v63  ;;  %1464 = vrsqrt.f32 %v2633_v12  ;;  %v2641_v41 = vpop.xlane.xlu0 %675  ;;  %v634_v3 = vsub.f32 0.0, %v2664_v59  ;;  %vm731_vm13 = vcmp.eq.f32.partialorder %v2633_v12, inf }
 0x178   :  { %1466 = vrsqrt.f32 %v2641_v41  ;;  %v594_v20 = vsel %vm593_vm5, %v2539_v56, %v592_v15  ;;  %vm733_vm14 = vcmp.eq.f32.partialorder %v2633_v12, 0.0  ;;  %vm724_vm15 = vcmp.eq.f32.partialorder %v2641_v41, inf }
 0x179   :  { %v1459_v14 = vpop.eup %1458  ;;  %v587_v11 = vsel %vm586_vm7, %v2545_v63, %v585_v37  ;;  %v2690_v27 = vsel %vm595_vm6, %v596_v13, %v594_v20  ;;  %v734_v63 = vand.u32 2147483648, %v2633_v12  ;;  %vm726_vm0 = vcmp.eq.f32.partialorder %v2641_v41, 0.0 }
 0x17a   :  { %v2667_v43 = vpop.xlane.xlu1 %684  ;;  %v606_v28 = vmul.f32 %v1459_v14, %v2567_v45  ;;  %v1461_v31 = vpop.eup %1460  ;;  %v2694_v58 = vsel %vm588_vm8, %v589_v21, %v587_v11  ;;  %v637_v4 = vsub.f32 0.0, %v2690_v27  ;;  %v727_v5 = vand.u32 2147483648, %v2641_v41 }
 0x17b   :  { %1468 = vrsqrt.f32 %v2667_v43  ;;  %v2677_v36 = vpop.xlane.xlu0 %681  ;;  %v599_v62 = vmul.f32 %v1461_v31, %v2573_v48  ;;  %v636_v47 = vsub.f32 0.0, %v2694_v58  ;;  %vm745_vm1 = vcmp.eq.f32.partialorder %v2667_v43, inf }
 0x17c   :  { %1470 = vrsqrt.f32 %v2677_v36  ;;  %v608_v50 = vsel %vm607_vm9, %v2567_v45, %v606_v28  ;;  %vm747_vm2 = vcmp.eq.f32.partialorder %v2667_v43, 0.0  ;;  %v748_v13 = vand.u32 2147483648, %v2667_v43 }
 0x17d   :  { %1472 = vrsqrt.f32 %v2606_v0  ;;  %v1463_v19 = vpop.eup %1462  ;;  %v2717_v18 = vsel %vm609_vm10, %v610_v23, %v608_v50  ;;  %v2727_v32 = vsel %vm600_vm11, %v2573_v48, %v599_v62  ;;  %vm738_vm3 = vcmp.eq.f32.partialorder %v2677_v36, inf }
 0x17e   :  { %v2697_v8 = vpop.xlane.xlu1 %690  ;;  %vm740_vm4 = vcmp.eq.f32.partialorder %v2677_v36, 0.0  ;;  %v639_v16 = vsub.f32 0.0, %v2717_v18  ;;  %v2742_v40 = vmul.f32 %v1463_v19, %v2600_v34  ;;  %v741_v20 = vand.u32 2147483648, %v2677_v36 }
 0x17f   :  { %1474 = vrsqrt.f32 %v2697_v8  ;;  %v2705_v56 = vpop.xlane.xlu0 %687  ;;  %vm759_vm5 = vcmp.eq.f32.partialorder %v2697_v8, inf  ;;  %vm761_vm6 = vcmp.eq.f32.partialorder %v2697_v8, 0.0  ;;  %v762_v19 = vand.u32 2147483648, %v2697_v8 }
 0x180   :  { %1476 = vrsqrt.f32 %v2705_v56  ;;  %vm752_vm7 = vcmp.eq.f32.partialorder %v2705_v56, inf  ;;  %vm754_vm8 = vcmp.eq.f32.partialorder %v2705_v56, 0.0  ;;  %vm602_vm10 = vcmp.eq.f32.partialorder %v2573_v48, 0.0 }
 0x181   :  { %v1465_v53 = vpop.eup %1464 }
 0x182   :  { %v1467_v39 = vpop.eup %1466  ;;  %v730_v6 = vmul.f32 %v1465_v53, %v2633_v12  ;;  %v2722_v22 = vpop.xlane.xlu1 %696 }
 0x183   :  { %v723_v49 = vmul.f32 %v1467_v39, %v2641_v41  ;;  %1478 = vrsqrt.f32 %v2722_v22  ;;  %v2732_v45 = vpop.xlane.xlu0 %693  ;;  %vm773_vm9 = vcmp.eq.f32.partialorder %v2722_v22, inf  ;;  %vm775_vm11 = vcmp.eq.f32.partialorder %v2722_v22, 0.0 }
 0x184   :  { %v732_v30 = vsel %vm731_vm13, %v2633_v12, %v730_v6  ;;  %1480 = vrsqrt.f32 %v2732_v45  ;;  %vm621_vm13 = vcmp.eq.f32.partialorder %v2600_v34, inf  ;;  %v776_v54 = vand.u32 2147483648, %v2722_v22 }
 0x185   :  { %v1469_v33 = vpop.eup %1468  ;;  %v735_v38 = vsel %vm733_vm14, %v734_v63, %v732_v30  ;;  %v725_v15 = vsel %vm724_vm15, %v2641_v41, %v723_v49  ;;  %vm766_vm14 = vcmp.eq.f32.partialorder %v2732_v45, inf  ;;  %vm614_vm15 = vcmp.eq.f32.partialorder %v2606_v0, inf }
 0x186   :  { %v1471_v37 = vpop.eup %1470  ;;  %v835_v21 = vsub.f32 0.0, %v735_v38  ;;  %v728_v14 = vsel %vm726_vm0, %v727_v5, %v725_v15  ;;  %v744_v23 = vmul.f32 %v1469_v33, %v2667_v43  ;;  %v2753_v11 = vpop.xlane.xlu1 %702  ;;  %vm768_vm0 = vcmp.eq.f32.partialorder %v2732_v45, 0.0 }
 0x187   :  { %v1473_v28 = vpop.eup %1472  ;;  %v834_v31 = vsub.f32 0.0, %v728_v14  ;;  %v737_v12 = vmul.f32 %v1471_v37, %v2677_v36  ;;  %1482 = vrsqrt.f32 %v2753_v11  ;;  %v2758_v50 = vpop.xlane.xlu0 %699 }
 0x188   :  { %v2763_v41 = vsel %vm1266_vm12, %v627_v26, %v835_v21  ;;  %v746_v62 = vsel %vm745_vm1, %v2667_v43, %v744_v23  ;;  %1484 = vrsqrt.f32 %v2758_v50  ;;  %vm787_vm1 = vcmp.eq.f32.partialorder %v2753_v11, inf }
 0x189   :  { %v1475_v63 = vpop.eup %1474  ;;  %v2773_v53 = vsel %vm1266_vm12, %v626_v25, %v834_v31  ;;  %v749_v61 = vsel %vm747_vm2, %v748_v13, %v746_v62  ;;  %v739_v26 = vsel %vm738_vm3, %v2677_v36, %v737_v12  ;;  %v755_v13 = vand.u32 2147483648, %v2705_v56 }
 0x18a   :  { %v1477_v5 = vpop.eup %1476  ;;  %v837_v39 = vsub.f32 0.0, %v749_v61  ;;  %v742_v6 = vsel %vm740_vm4, %v741_v20, %v739_v26  ;;  %v758_v49 = vmul.f32 %v1475_v63, %v2697_v8  ;;  %v2785_v1 = vpop.xlane.xlu1 %708  ;;  %v769_v62 = vand.u32 2147483648, %v2732_v45 }
 0x18b   :  { %v836_v25 = vsub.f32 0.0, %v742_v6  ;;  %v751_v43 = vmul.f32 %v1477_v5, %v2705_v56  ;;  %v2790_v30 = vpop.xlane.xlu0 %705  ;;  %1486 = vrsqrt.f32 %v2785_v1  ;;  %v613_v61 = vmul.f32 %v1473_v28, %v2606_v0 }
 0x18c   :  { %v2795_v36 = vsel %vm1266_vm12, %v629_v51, %v837_v39  ;;  %v760_v33 = vsel %vm759_vm5, %v2697_v8, %v758_v49  ;;  %1488 = vrsqrt.f32 %v2790_v30  ;;  %vm789_vm2 = vcmp.eq.f32.partialorder %v2753_v11, 0.0 }
 0x18d   :  { %v1479_v38 = vpop.eup %1478  ;;  %v2806_v15 = vsel %vm1266_vm12, %v628_v42, %v836_v25  ;;  %v763_v7 = vsel %vm761_vm6, %v762_v19, %v760_v33  ;;  %v753_v51 = vsel %vm752_vm7, %v2705_v56, %v751_v43  ;;  %vm780_vm3 = vcmp.eq.f32.partialorder %v2758_v50, inf }
 0x18e   :  { %v1481_v37 = vpop.eup %1480  ;;  %v839_v21 = vsub.f32 0.0, %v763_v7  ;;  %v756_v14 = vsel %vm754_vm8, %v755_v13, %v753_v51  ;;  %v772_v23 = vmul.f32 %v1479_v38, %v2722_v22  ;;  %v2817_v42 = vpop.xlane.xlu1 %714  ;;  %v783_v33 = vand.u32 2147483648, %v2758_v50 }
 0x18f   :  { %v838_v20 = vsub.f32 0.0, %v756_v14  ;;  %v765_v8 = vmul.f32 %v1481_v37, %v2732_v45  ;;  %v2822_v31 = vpop.xlane.xlu0 %711  ;;  %1490 = vrsqrt.f32 %v2817_v42  ;;  %vm782_vm4 = vcmp.eq.f32.partialorder %v2758_v50, 0.0 }
 0x190   :  { %v2828_v56 = vsel %vm1266_vm12, %v631_v10, %v839_v21  ;;  %v774_v12 = vsel %vm773_vm9, %v2722_v22, %v772_v23  ;;  %1492 = vrsqrt.f32 %v2822_v31  ;;  %vm801_vm5 = vcmp.eq.f32.partialorder %v2785_v1, inf }
 0x191   :  { %v1483_v19 = vpop.eup %1482  ;;  %v2838_v63 = vsel %vm1266_vm12, %v630_v52, %v838_v20  ;;  %v777_v24 = vsel %vm775_vm11, %v776_v54, %v774_v12  ;;  %v767_v10 = vsel %vm766_vm14, %v2732_v45, %v765_v8  ;;  %v790_v52 = vand.u32 2147483648, %v2753_v11 }
 0x192   :  { %v841_v26 = vsub.f32 0.0, %v777_v24  ;;  %v770_v5 = vsel %vm768_vm0, %v769_v62, %v767_v10  ;;  %v786_v39 = vmul.f32 %v1483_v19, %v2753_v11  ;;  %v2846_v6 = vpop.xlane.xlu1 %720  ;;  %v1485_v49 = vpop.eup %1484  ;;  %vm803_vm6 = vcmp.eq.f32.partialorder %v2785_v1, 0.0 }
 0x193   :  { %v840_v17 = vsub.f32 0.0, %v770_v5  ;;  %v2851_v22 = vpop.xlane.xlu0 %717  ;;  %v779_v25 = vmul.f32 %v1485_v49, %v2758_v50  ;;  %1494 = vrsqrt.f32 %v2846_v6  ;;  %vm794_vm7 = vcmp.eq.f32.partialorder %v2790_v30, inf }
 0x194   :  { %v2856_v45 = vsel %vm1266_vm12, %v633_v60, %v841_v26  ;;  %v788_v28 = vsel %vm787_vm1, %v2753_v11, %v786_v39  ;;  %v2873_v60 = vsel %vm602_vm10, %v603_v2, %v2727_v32  ;;  %1496 = vrsqrt.f32 %v2851_v22 }
 0x195   :  { %v2864_v43 = vsel %vm1266_vm12, %v632_v46, %v840_v17  ;;  %v791_v13 = vsel %vm789_vm2, %v790_v52, %v788_v28  ;;  %v1487_v29 = vpop.eup %1486  ;;  %v781_v38 = vsel %vm780_vm3, %v2758_v50, %v779_v25  ;;  %v622_v46 = vsel %vm621_vm13, %v2600_v34, %v2742_v40 }
 0x196   :  { %v843_v11 = vsub.f32 0.0, %v791_v13  ;;  %v2877_v9 = vpop.xlane.xlu1 %902  ;;  %v784_v7 = vsel %vm782_vm4, %v783_v33, %v781_v38  ;;  %v800_v51 = vmul.f32 %v1487_v29, %v2785_v1  ;;  %v804_v50 = vand.u32 2147483648, %v2785_v1  ;;  %v1489_v37 = vpop.eup %1488 }
 0x197   :  { %v2885_v48 = vpop.xlane.xlu0 %899  ;;  %v842_v32 = vsub.f32 0.0, %v784_v7  ;;  %v615_v40 = vsel %vm614_vm15, %v2606_v0, %v613_v61  ;;  %v793_v14 = vmul.f32 %v1489_v37, %v2790_v30  ;;  %vm796_vm8 = vcmp.eq.f32.partialorder %v2790_v30, 0.0 }
 0x198   :  { %v2890_v2 = vsel %vm1266_vm12, %v635_v55, %v843_v11  ;;  %v802_v21 = vsel %vm801_vm5, %v2785_v1, %v800_v51  ;;  %v797_v1 = vand.u32 2147483648, %v2790_v30  ;;  %vm815_vm9 = vcmp.eq.f32.partialorder %v2817_v42, inf }
 0x199   :  { %v2903_v35 = vsel %vm1266_vm12, %v634_v3, %v842_v32  ;;  %v805_v55 = vsel %vm803_vm6, %v804_v50, %v802_v21  ;;  %v1491_v54 = vpop.eup %1490  ;;  %v795_v59 = vsel %vm794_vm7, %v2790_v30, %v793_v14  ;;  %vm817_vm10 = vcmp.eq.f32.partialorder %v2817_v42, 0.0 }
 0x19a   :  { %v2907_v23 = vpop.xlane.xlu1 %908  ;;  %v845_v20 = vsub.f32 0.0, %v805_v55  ;;  %v814_v3 = vmul.f32 %v1491_v54, %v2817_v42  ;;  %1498 = vrsqrt.f32 %v2877_v9  ;;  %v1493_v12 = vpop.eup %1492  ;;  %v798_v19 = vsel %vm796_vm8, %v797_v1, %v795_v59 }
 0x19b   :  { %v2912_v8 = vpop.xlane.xlu0 %905  ;;  %v818_v24 = vand.u32 2147483648, %v2817_v42  ;;  %1500 = vrsqrt.f32 %v2885_v48  ;;  %v844_v10 = vsub.f32 0.0, %v798_v19  ;;  %v807_v61 = vmul.f32 %v1493_v12, %v2822_v31 }
 0x19c   :  { %v2921_v62 = vsel %vm1266_vm12, %v637_v4, %v845_v20  ;;  %v816_v30 = vsel %vm815_vm9, %v2817_v42, %v814_v3  ;;  %1502 = vrsqrt.f32 %v2907_v23  ;;  %vm808_vm11 = vcmp.eq.f32.partialorder %v2822_v31, inf }
 0x19d   :  { %v819_v5 = vsel %vm817_vm10, %v818_v24, %v816_v30  ;;  %v811_v27 = vand.u32 2147483648, %v2822_v31  ;;  %1504 = vrsqrt.f32 %v2912_v8  ;;  %v2938_v39 = vsel %vm1266_vm12, %v636_v47, %v844_v10  ;;  %v1495_v28 = vpop.eup %1494 }
 0x19e   :  { %v2928_v26 = vpop.xlane.xlu1 %914  ;;  %v847_v42 = vsub.f32 0.0, %v819_v5  ;;  %v809_v49 = vsel %vm808_vm11, %v2822_v31, %v807_v61  ;;  %vm810_vm13 = vcmp.eq.f32.partialorder %v2822_v31, 0.0  ;;  %v638_v17 = vsub.f32 0.0, %v2873_v60  ;;  %v1497_v29 = vpop.eup %1496 }
 0x19f   :  { %v2933_v4 = vpop.xlane.xlu0 %911  ;;  %vm623_vm14 = vcmp.eq.f32.partialorder %v2600_v34, 0.0  ;;  %vm616_vm15 = vcmp.eq.f32.partialorder %v2606_v0, 0.0  ;;  %v812_v52 = vsel %vm810_vm13, %v811_v27, %v809_v49  ;;  %1506 = vrsqrt.f32 %v2928_v26 }
 0x1a0   :  { %v2947_v25 = vsel %vm623_vm14, %v624_v44, %v622_v46  ;;  %v2951_v58 = vsel %vm616_vm15, %v617_v57, %v615_v40  ;;  %v2956_v47 = vsel %vm1266_vm12, %v639_v16, %v847_v42  ;;  %v846_v31 = vsub.f32 0.0, %v812_v52 }
 0x1a1   :  { %v828_v57 = vmul.f32 %v1495_v28, %v2846_v6  ;;  %1508 = vrsqrt.f32 %v2933_v4  ;;  %vm829_vm0 = vcmp.eq.f32.partialorder %v2846_v6, inf  ;;  %vm831_vm1 = vcmp.eq.f32.partialorder %v2846_v6, 0.0 }
 0x1a2   :  { %v2958_v13 = vpop.xlane.xlu1 %920  ;;  %v2964_v34 = vsel %vm1266_vm12, %v638_v17, %v846_v31  ;;  %v832_v16 = vand.u32 2147483648, %v2846_v6  ;;  %vm822_vm2 = vcmp.eq.f32.partialorder %v2851_v22, inf  ;;  %v821_v38 = vmul.f32 %v1497_v29, %v2851_v22 }
 0x1a3   :  { %v2961_v33 = vpop.xlane.xlu0 %917  ;;  %vm824_vm3 = vcmp.eq.f32.partialorder %v2851_v22, 0.0  ;;  %v825_v46 = vand.u32 2147483648, %v2851_v22  ;;  %vm955_vm4 = vcmp.eq.f32.partialorder %v2877_v9, inf  ;;  %vm957_vm5 = vcmp.eq.f32.partialorder %v2877_v9, 0.0 }
 0x1a4   :  { %v1499_v18 = vpop.eup %1498  ;;  %v958_v32 = vand.u32 2147483648, %v2877_v9  ;;  %vm948_vm6 = vcmp.eq.f32.partialorder %v2885_v48, inf  ;;  %1510 = vrsqrt.f32 %v2958_v13  ;;  %v830_v37 = vsel %vm829_vm0, %v2846_v6, %v828_v57 }
 0x1a5   :  { %v1501_v11 = vpop.eup %1500  ;;  %v954_v40 = vmul.f32 %v1499_v18, %v2877_v9  ;;  %vm950_vm7 = vcmp.eq.f32.partialorder %v2885_v48, 0.0  ;;  %v951_v21 = vand.u32 2147483648, %v2885_v48  ;;  %vm969_vm8 = vcmp.eq.f32.partialorder %v2907_v23, inf }
 0x1a6   :  { %v2974_v60 = vpop.xlane.xlu1 %926  ;;  %v1503_v51 = vpop.eup %1502  ;;  %v947_v55 = vmul.f32 %v1501_v11, %v2885_v48  ;;  %vm971_vm9 = vcmp.eq.f32.partialorder %v2907_v23, 0.0  ;;  %1512 = vrsqrt.f32 %v2961_v33  ;;  %v823_v54 = vsel %vm822_vm2, %v2851_v22, %v821_v38 }
 0x1a7   :  { %v2980_v7 = vpop.xlane.xlu0 %923  ;;  %v1505_v50 = vpop.eup %1504  ;;  %v968_v20 = vmul.f32 %v1503_v51, %v2907_v23  ;;  %v972_v1 = vand.u32 2147483648, %v2907_v23  ;;  %1514 = vrsqrt.f32 %v2974_v60  ;;  %v3008_v3 = vsel %vm831_vm1, %v832_v16, %v830_v37 }
 0x1a8   :  { %v961_v12 = vmul.f32 %v1505_v50, %v2912_v8  ;;  %vm962_vm10 = vcmp.eq.f32.partialorder %v2912_v8, inf  ;;  %vm964_vm11 = vcmp.eq.f32.partialorder %v2912_v8, 0.0  ;;  %v956_v24 = vsel %vm955_vm4, %v2877_v9, %v954_v40 }
 0x1a9   :  { %v1507_v19 = vpop.eup %1506  ;;  %v965_v10 = vand.u32 2147483648, %v2912_v8  ;;  %vm983_vm13 = vcmp.eq.f32.partialorder %v2928_v26, inf  ;;  %1516 = vrsqrt.f32 %v2980_v7  ;;  %v3021_v6 = vsel %vm824_vm3, %v825_v46, %v823_v54 }
 0x1aa   :  { %v2996_v14 = vpop.xlane.xlu1 %932  ;;  %v949_v30 = vsel %vm948_vm6, %v2885_v48, %v947_v55  ;;  %vm985_vm14 = vcmp.eq.f32.partialorder %v2928_v26, 0.0  ;;  %v849_v27 = vsub.f32 0.0, %v3008_v3  ;;  %v970_v42 = vsel %vm969_vm8, %v2907_v23, %v968_v20 }
 0x1ab   :  { %v3004_v59 = vpop.xlane.xlu0 %929  ;;  %1518 = vrsqrt.f32 %v2996_v14  ;;  %v1509_v5 = vpop.eup %1508  ;;  %v986_v22 = vand.u32 2147483648, %v2928_v26  ;;  %vm976_vm15 = vcmp.eq.f32.partialorder %v2933_v4, inf  ;;  %v3040_v17 = vsel %vm957_vm5, %v958_v32, %v956_v24 }
 0x1ac   :  { %v963_v52 = vsel %vm962_vm10, %v2912_v8, %v961_v12  ;;  %v982_v28 = vmul.f32 %v1507_v19, %v2928_v26  ;;  %1520 = vrsqrt.f32 %v3004_v59  ;;  %v3050_v29 = vsel %vm950_vm7, %v951_v21, %v949_v30 }
 0x1ad   :  { %vm978_vm0 = vcmp.eq.f32.partialorder %v2933_v4, 0.0  ;;  %v979_v9 = vand.u32 2147483648, %v2933_v4  ;;  %v3056_v18 = vsel %vm971_vm9, %v972_v1, %v970_v42  ;;  %v975_v16 = vmul.f32 %v1509_v5, %v2933_v4 }
 0x1ae   :  { %v3028_v61 = vpop.xlane.xlu1 %938  ;;  %v1511_v57 = vpop.eup %1510  ;;  %vm997_vm1 = vcmp.eq.f32.partialorder %v2958_v13, inf  ;;  %v1059_v48 = vsub.f32 0.0, %v3040_v17  ;;  %v3066_v38 = vsel %vm964_vm11, %v965_v10, %v963_v52  ;;  %vm999_vm2 = vcmp.eq.f32.partialorder %v2958_v13, 0.0 }
 0x1af   :  { %v3036_v49 = vpop.xlane.xlu0 %935  ;;  %1522 = vrsqrt.f32 %v3028_v61  ;;  %v1058_v51 = vsub.f32 0.0, %v3050_v29  ;;  %v984_v32 = vsel %vm983_vm13, %v2928_v26, %v982_v28  ;;  %v1000_v50 = vand.u32 2147483648, %v2958_v13 }
 0x1b0   :  { %1524 = vrsqrt.f32 %v3036_v49  ;;  %v1513_v46 = vpop.eup %1512  ;;  %vm990_vm3 = vcmp.eq.f32.partialorder %v2961_v33, inf  ;;  %v1061_v37 = vsub.f32 0.0, %v3056_v18  ;;  %v996_v40 = vmul.f32 %v1511_v57, %v2958_v13 }
 0x1b1   :  { %v1515_v8 = vpop.eup %1514  ;;  %vm992_vm4 = vcmp.eq.f32.partialorder %v2961_v33, 0.0  ;;  %v993_v21 = vand.u32 2147483648, %v2961_v33  ;;  %vm1011_vm5 = vcmp.eq.f32.partialorder %v2974_v60, inf  ;;  %v1060_v55 = vsub.f32 0.0, %v3066_v38 }
 0x1b2   :  { %v3061_v11 = vpop.xlane.xlu1 %944  ;;  %v977_v54 = vsel %vm976_vm15, %v2933_v4, %v975_v16  ;;  %vm1013_vm6 = vcmp.eq.f32.partialorder %v2974_v60, 0.0  ;;  %v1014_v20 = vand.u32 2147483648, %v2974_v60  ;;  %vm1004_vm7 = vcmp.eq.f32.partialorder %v2980_v7, inf }
 0x1b3   :  { %v3070_v23 = vpop.xlane.xlu0 %941  ;;  %v1517_v12 = vpop.eup %1516  ;;  %v3094_v19 = vsel %vm985_vm14, %v986_v22, %v984_v32  ;;  %v989_v24 = vmul.f32 %v1513_v46, %v2961_v33  ;;  %vm1006_vm8 = vcmp.eq.f32.partialorder %v2980_v7, 0.0  ;;  %v1007_v10 = vand.u32 2147483648, %v2980_v7 }
 0x1b4   :  { %vm1025_vm9 = vcmp.eq.f32.partialorder %v2996_v14, inf  ;;  %vm1283_vm10 = vcmask 15360   ;;  %v1010_v42 = vmul.f32 %v1515_v8, %v2974_v60  ;;  %vm1027_vm11 = vcmp.eq.f32.partialorder %v2996_v14, 0.0 }
 0x1b5   :  { %v1519_v5 = vpop.eup %1518  ;;  %v1028_v26 = vand.u32 2147483648, %v2996_v14  ;;  %vm1018_vm13 = vcmp.eq.f32.partialorder %v3004_v59, inf  ;;  %v3108_v22 = vsel %vm978_vm0, %v979_v9, %v977_v54  ;;  %v998_v52 = vsel %vm997_vm1, %v2958_v13, %v996_v40 }
 0x1b6   :  { %v3090_v1 = vpop.xlane.xlu1 %1110  ;;  %v1003_v28 = vmul.f32 %v1517_v12, %v2980_v7  ;;  %1526 = vrsqrt.f32 %v3061_v11  ;;  %v1521_v57 = vpop.eup %1520  ;;  %v1063_v16 = vsub.f32 0.0, %v3094_v19  ;;  %v1024_v46 = vmul.f32 %v1519_v5, %v2996_v14 }
 0x1b7   :  { %v3100_v30 = vpop.xlane.xlu0 %1107  ;;  %vm1020_vm14 = vcmp.eq.f32.partialorder %v3004_v59, 0.0  ;;  %1528 = vrsqrt.f32 %v3090_v1  ;;  %v991_v9 = vsel %vm990_vm3, %v2961_v33, %v989_v24  ;;  %v1021_v32 = vand.u32 2147483648, %v3004_v59 }
 0x1b8   :  { %vm1039_vm15 = vcmp.eq.f32.partialorder %v3028_v61, inf  ;;  %1530 = vrsqrt.f32 %v3070_v23  ;;  %v1062_v54 = vsub.f32 0.0, %v3108_v22  ;;  %v3132_v12 = vsel %vm999_vm2, %v1000_v50, %v998_v52 }
 0x1b9   :  { %v1523_v40 = vpop.eup %1522  ;;  %v1012_v5 = vsel %vm1011_vm5, %v2974_v60, %v1010_v42  ;;  %v1017_v24 = vmul.f32 %v1521_v57, %v3004_v59  ;;  %v1005_v31 = vsel %vm1004_vm7, %v2980_v7, %v1003_v28  ;;  %vm1041_vm0 = vcmp.eq.f32.partialorder %v3028_v61, 0.0 }
 0x1ba   :  { %v3119_v4 = vpop.xlane.xlu1 %1116  ;;  %v1525_v44 = vpop.eup %1524  ;;  %v1042_v0 = vand.u32 2147483648, %v3028_v61  ;;  %1532 = vrsqrt.f32 %v3100_v30  ;;  %v3146_v13 = vsel %vm992_vm4, %v993_v21, %v991_v9  ;;  %v1026_v50 = vsel %vm1025_vm9, %v2996_v14, %v1024_v46 }
 0x1bb   :  { %v3127_v8 = vpop.xlane.xlu0 %1113  ;;  %v1038_v42 = vmul.f32 %v1523_v40, %v3028_v61  ;;  %vm1032_vm1 = vcmp.eq.f32.partialorder %v3036_v49, inf  ;;  %vm1300_vm2 = vcmask 23552   ;;  %v1065_v28 = vsub.f32 0.0, %v3132_v12 }
 0x1bc   :  { %v3158_v57 = vsel %vm1013_vm6, %v1014_v20, %v1012_v5  ;;  %vm1034_vm3 = vcmp.eq.f32.partialorder %v3036_v49, 0.0  ;;  %v1035_v33 = vand.u32 2147483648, %v3036_v49  ;;  %vm1317_vm4 = vcmask 31744  }
 0x1bd   :  { %v3166_v46 = vsel %vm1006_vm8, %v1007_v10, %v1005_v31  ;;  %v1019_v9 = vsel %vm1018_vm13, %v3004_v59, %v1017_v24  ;;  %v1031_v40 = vmul.f32 %v1525_v44, %v3036_v49  ;;  %1534 = vrsqrt.f32 %v3119_v4 }
 0x1be   :  { %v3153_v52 = vpop.xlane.xlu1 %1122  ;;  %v1064_v60 = vsub.f32 0.0, %v3146_v13  ;;  %v3176_v20 = vsel %vm1027_vm11, %v1028_v26, %v1026_v50  ;;  %vm1053_vm5 = vcmp.eq.f32.partialorder %v3061_v11, inf  ;;  %v1067_v10 = vsub.f32 0.0, %v3158_v57 }
 0x1bf   :  { %v3162_v21 = vpop.xlane.xlu0 %1119  ;;  %v1040_v44 = vsel %vm1039_vm15, %v3028_v61, %v1038_v42  ;;  %v1285_v5 = vsel %vm1283_vm10, %v2763_v41, %v1059_v48  ;;  %vm1163_vm6 = vcmp.eq.f32.partialorder %v3090_v1, inf  ;;  %v1066_v24 = vsub.f32 0.0, %v3166_v46 }
 0x1c0   :  { %v1527_v26 = vpop.eup %1526  ;;  %v3195_v50 = vsel %vm1020_vm14, %v1021_v32, %v1019_v9  ;;  %vm1046_vm7 = vcmp.eq.f32.partialorder %v3070_v23, inf  ;;  %vm1165_vm8 = vcmp.eq.f32.partialorder %v3090_v1, 0.0  ;;  %1536 = vrsqrt.f32 %v3127_v8 }
 0x1c1   :  { %v1529_v41 = vpop.eup %1528  ;;  %v1033_v42 = vsel %vm1032_vm1, %v3036_v49, %v1031_v40  ;;  %v1166_v31 = vand.u32 2147483648, %v3090_v1  ;;  %v1284_v59 = vsel %vm1283_vm10, %v2773_v53, %v1058_v51  ;;  %v3213_v9 = vsel %vm1041_vm0, %v1042_v0, %v1040_v44 }
 0x1c2   :  { %v3190_v14 = vpop.xlane.xlu1 %1128  ;;  %v1531_v32 = vpop.eup %1530  ;;  %v1162_v7 = vmul.f32 %v1529_v41, %v3090_v1  ;;  %vm1156_vm9 = vcmp.eq.f32.partialorder %v3100_v30, inf  ;;  %1538 = vrsqrt.f32 %v3153_v52  ;;  %v1068_v40 = vsub.f32 0.0, %v3195_v50 }
 0x1c3   :  { %v3200_v17 = vpop.xlane.xlu0 %1125  ;;  %v1052_v48 = vmul.f32 %v1527_v26, %v3061_v11  ;;  %vm1158_vm11 = vcmp.eq.f32.partialorder %v3100_v30, 0.0  ;;  %v1159_v29 = vand.u32 2147483648, %v3100_v30  ;;  %v3226_v0 = vsel %vm1034_vm3, %v1035_v33, %v1033_v42 }
 0x1c4   :  { %v1533_v51 = vpop.eup %1532  ;;  %v1164_v61 = vsel %vm1163_vm6, %v3090_v1, %v1162_v7  ;;  %v1287_v44 = vsel %vm1283_vm10, %v2795_v36, %v1061_v37  ;;  %1540 = vrsqrt.f32 %v3162_v21  ;;  %v1071_v26 = vsub.f32 0.0, %v3213_v9 }
 0x1c5   :  { %v1045_v41 = vmul.f32 %v1531_v32, %v3070_v23  ;;  %v1167_v49 = vsel %vm1165_vm8, %v1166_v31, %v1164_v61  ;;  %v1155_v33 = vmul.f32 %v1533_v51, %v3100_v30  ;;  %vm1177_vm13 = vcmp.eq.f32.partialorder %v3119_v4, inf }
 0x1c6   :  { %v3222_v53 = vpop.xlane.xlu1 %1134  ;;  %v1302_v7 = vsel %vm1300_vm2, %v1285_v5, %v1167_v49  ;;  %vm1179_vm14 = vcmp.eq.f32.partialorder %v3119_v4, 0.0  ;;  %1542 = vrsqrt.f32 %v3190_v14  ;;  %v1070_v18 = vsub.f32 0.0, %v3226_v0 }
 0x1c7   :  { %v3241_v42 = vpop.xlane.xlu0 %1131  ;;  %v1535_v36 = vpop.eup %1534  ;;  %v3251_v37 = vsel %vm1053_vm5, %v3061_v11, %v1052_v48  ;;  %1319 = vst.msk [vmem:[%s3528_s4 + $0x8] sm:$0xff] %vm1317_vm4, %v1302_v7  ;;  %v1157_v1 = vsel %vm1156_vm9, %v3100_v30, %v1155_v33  ;;  %v1180_v31 = vand.u32 2147483648, %v3119_v4  ;;  %v1286_v48 = vsel %vm1283_vm10, %v2806_v15, %v1060_v55 }
 0x1c8   :  { %v1160_v5 = vsel %vm1158_vm11, %v1159_v29, %v1157_v1  ;;  %v1176_v32 = vmul.f32 %v1535_v36, %v3119_v4  ;;  %1544 = vrsqrt.f32 %v3200_v17  ;;  %v3272_v51 = vsel %vm1046_vm7, %v3070_v23, %v1045_v41 }
 0x1c9   :  { %v1301_v61 = vsel %vm1300_vm2, %v1284_v59, %v1160_v5  ;;  %vm1170_vm15 = vcmp.eq.f32.partialorder %v3127_v8, inf  ;;  %vm1172_vm0 = vcmp.eq.f32.partialorder %v3127_v8, 0.0  ;;  %v1173_v38 = vand.u32 2147483648, %v3127_v8 }
 0x1ca   :  { %v3277_v30 = vpop.xlane.xlu1 %1140  ;;  %v1537_v29 = vpop.eup %1536  ;;  %1318 = vst.msk [vmem:[%s3528_s4] sm:$0xff] %vm1317_vm4, %v1301_v61  ;;  %v1178_v15 = vsel %vm1177_vm13, %v3119_v4, %v1176_v32  ;;  %v1289_v55 = vsel %vm1283_vm10, %v2828_v56, %v1063_v16  ;;  %1546 = vrsqrt.f32 %v3222_v53  ;;  %vm1191_vm1 = vcmp.eq.f32.partialorder %v3153_v52, inf }
 0x1cb   :  { %v1181_v59 = vsel %vm1179_vm14, %v1180_v31, %v1178_v15  ;;  %v1169_v41 = vmul.f32 %v1537_v29, %v3127_v8  ;;  %vm1193_vm3 = vcmp.eq.f32.partialorder %v3153_v52, 0.0  ;;  %v3297_v49 = vpop.xlane.xlu0 %1137  ;;  %v1194_v19 = vand.u32 2147483648, %v3153_v52 }
 0x1cc   :  { %v1539_v33 = vpop.eup %1538  ;;  %v1304_v7 = vsel %vm1300_vm2, %v1287_v44, %v1181_v59  ;;  %v1288_v56 = vsel %vm1283_vm10, %v2838_v63, %v1062_v54  ;;  %1548 = vrsqrt.f32 %v3241_v42  ;;  %vm1184_vm5 = vcmp.eq.f32.partialorder %v3162_v21, inf }
 0x1cd   :  { %1321 = vst.msk [vmem:[%s3528_s4 + $0x18] sm:$0xff] %vm1317_vm4, %v1304_v7  ;;  %v1171_v16 = vsel %vm1170_vm15, %v3127_v8, %v1169_v41  ;;  %v1190_v4 = vmul.f32 %v1539_v33, %v3153_v52  ;;  %vm1186_vm6 = vcmp.eq.f32.partialorder %v3162_v21, 0.0  ;;  %v1187_v54 = vand.u32 2147483648, %v3162_v21 }
 0x1ce   :  { %v1541_v22 = vpop.eup %1540  ;;  %v1174_v63 = vsel %vm1172_vm0, %v1173_v38, %v1171_v16  ;;  %v1291_v44 = vsel %vm1283_vm10, %v2856_v45, %v1065_v28  ;;  %1550 = vrsqrt.f32 %v3277_v30  ;;  %vm1205_vm7 = vcmp.eq.f32.partialorder %v3190_v14, inf  ;;  %v3330_v8 = vpop.xlane.xlu1 %1146 }
 0x1cf   :  { %v1303_v36 = vsel %vm1300_vm2, %v1286_v48, %v1174_v63  ;;  %v1192_v1 = vsel %vm1191_vm1, %v3153_v52, %v1190_v4  ;;  %v1183_v31 = vmul.f32 %v1541_v22, %v3162_v21  ;;  %vm1207_vm8 = vcmp.eq.f32.partialorder %v3190_v14, 0.0  ;;  %v3350_v61 = vpop.xlane.xlu0 %1143 }
 0x1d0   :  { %v1543_v5 = vpop.eup %1542  ;;  %1320 = vst.msk [vmem:[%s3528_s4 + $0x10] sm:$0xff] %vm1317_vm4, %v1303_v36  ;;  %v1195_v45 = vsel %vm1193_vm3, %v1194_v19, %v1192_v1  ;;  %v1208_v12 = vand.u32 2147483648, %v3190_v14  ;;  %1552 = vrsqrt.f32 %v3297_v49  ;;  %v1290_v52 = vsel %vm1283_vm10, %v2864_v43, %v1064_v60 }
 0x1d1   :  { %v1306_v28 = vsel %vm1300_vm2, %v1289_v55, %v1195_v45  ;;  %v1185_v32 = vsel %vm1184_vm5, %v3162_v21, %v1183_v31  ;;  %v1204_v48 = vmul.f32 %v1543_v5, %v3190_v14  ;;  %vm1198_vm9 = vcmp.eq.f32.partialorder %v3200_v17, inf }
 0x1d2   :  { %v1545_v29 = vpop.eup %1544  ;;  %1323 = vst.msk [vmem:[%s3528_s4 + $0x28] sm:$0xff] %vm1317_vm4, %v1306_v28  ;;  %v1188_v15 = vsel %vm1186_vm6, %v1187_v54, %v1185_v32  ;;  %vm1200_vm11 = vcmp.eq.f32.partialorder %v3200_v17, 0.0  ;;  %1554 = vrsqrt.f32 %v3330_v8  ;;  %v1201_v38 = vand.u32 2147483648, %v3200_v17  ;;  %v3383_v19 = vpop.xlane.xlu1 %1152 }
 0x1d3   :  { %v1305_v13 = vsel %vm1300_vm2, %v1288_v56, %v1188_v15  ;;  %v1206_v43 = vsel %vm1205_vm7, %v3190_v14, %v1204_v48  ;;  %v1197_v60 = vmul.f32 %v1545_v29, %v3200_v17  ;;  %v1293_v59 = vsel %vm1283_vm10, %v2890_v2, %v1067_v10  ;;  %v3408_v63 = vpop.xlane.xlu0 %1149 }
 0x1d4   :  { %v1547_v55 = vpop.eup %1546  ;;  %1322 = vst.msk [vmem:[%s3528_s4 + $0x20] sm:$0xff] %vm1317_vm4, %v1305_v13  ;;  %v1209_v21 = vsel %vm1207_vm8, %v1208_v12, %v1206_v43  ;;  %vm1219_vm13 = vcmp.eq.f32.partialorder %v3222_v53, inf  ;;  %vm1221_vm14 = vcmp.eq.f32.partialorder %v3222_v53, 0.0  ;;  %1556 = vrsqrt.f32 %v3350_v61 }
 0x1d5   :  { %v1308_v41 = vsel %vm1300_vm2, %v1291_v44, %v1209_v21  ;;  %v1199_v33 = vsel %vm1198_vm9, %v3200_v17, %v1197_v60  ;;  %v1218_v7 = vmul.f32 %v1547_v55, %v3222_v53  ;;  %vm1055_vm15 = vcmp.eq.f32.partialorder %v3061_v11, 0.0 }
 0x1d6   :  { %v1549_v14 = vpop.eup %1548  ;;  %1325 = vst.msk [vmem:[%s3528_s4 + $0x38] sm:$0xff] %vm1317_vm4, %v1308_v41  ;;  %v1202_v2 = vsel %vm1200_vm11, %v1201_v38, %v1199_v33  ;;  %v1222_v57 = vand.u32 2147483648, %v3222_v53  ;;  %v1292_v10 = vsel %vm1283_vm10, %v2903_v35, %v1066_v24  ;;  %vm1212_vm0 = vcmp.eq.f32.partialorder %v3241_v42, inf }
 0x1d7   :  { %v1307_v56 = vsel %vm1300_vm2, %v1290_v52, %v1202_v2  ;;  %v1220_v16 = vsel %vm1219_vm13, %v3222_v53, %v1218_v7  ;;  %v1211_v4 = vmul.f32 %v1549_v14, %v3241_v42  ;;  %v3586_v17 = vsub.f32 0.0, %v2947_v25 }
 0x1d8   :  { %v1551_v46 = vpop.eup %1550  ;;  %1324 = vst.msk [vmem:[%s3528_s4 + $0x30] sm:$0xff] %vm1317_vm4, %v1307_v56  ;;  %v1223_v35 = vsel %vm1221_vm14, %v1222_v57, %v1220_v16  ;;  %vm1214_vm1 = vcmp.eq.f32.partialorder %v3241_v42, 0.0  ;;  %v1215_v3 = vand.u32 2147483648, %v3241_v42  ;;  %1558 = vrsqrt.f32 %v3383_v19 }
 0x1d9   :  { %v3406_v22 = vsel %vm1266_vm12, %v3586_v17, %v849_v27  ;;  %v1310_v25 = vsel %vm1300_vm2, %v1293_v59, %v1223_v35  ;;  %v1213_v27 = vsel %vm1212_vm0, %v3241_v42, %v1211_v4  ;;  %v1232_v24 = vmul.f32 %v1551_v46, %v3277_v30 }
 0x1da   :  { %vm1233_vm3 = vcmp.eq.f32.partialorder %v3277_v30, inf  ;;  %v1553_v54 = vpop.eup %1552  ;;  %1327 = vst.msk [vmem:[%s3528_s4 + $0x48] sm:$0xff] %vm1317_vm4, %v1310_v25  ;;  %v1216_v53 = vsel %vm1214_vm1, %v1215_v3, %v1213_v27  ;;  %v1236_v44 = vand.u32 2147483648, %v3277_v30  ;;  %v3587_v36 = vsub.f32 0.0, %v3021_v6 }
 0x1db   :  { %v3588_v1 = vsub.f32 0.0, %v2951_v58  ;;  %1560 = vrsqrt.f32 %v3408_v63  ;;  %v1309_v42 = vsel %vm1300_vm2, %v1292_v10, %v1216_v53  ;;  %v1234_v5 = vsel %vm1233_vm3, %v3277_v30, %v1232_v24 }
 0x1dc   :  { %vm1235_vm5 = vcmp.eq.f32.partialorder %v3277_v30, 0.0  ;;  %v1225_v45 = vmul.f32 %v1553_v54, %v3297_v49  ;;  %v1555_v12 = vpop.eup %1554  ;;  %1326 = vst.msk [vmem:[%s3528_s4 + $0x40] sm:$0xff] %vm1317_vm4, %v1309_v42  ;;  %v3589_v58 = vsub.f32 0.0, %v3176_v20  ;;  %v1229_v32 = vand.u32 2147483648, %v3297_v49 }
 0x1dd   :  { %v1281_v31 = vsel %vm1266_vm12, %v3588_v1, %v3587_v36  ;;  %v1237_v28 = vsel %vm1235_vm5, %v1236_v44, %v1234_v5  ;;  %vm1226_vm12 = vcmp.eq.f32.partialorder %v3297_v49, inf  ;;  %vm1228_vm6 = vcmp.eq.f32.partialorder %v3297_v49, 0.0 }
 0x1de   :  { %v1295_v6 = vsel %vm1283_vm10, %v2921_v62, %v3589_v58  ;;  %v1227_v48 = vsel %vm1226_vm12, %v3297_v49, %v1225_v45  ;;  %v1246_v52 = vmul.f32 %v1555_v12, %v3330_v8  ;;  %v1294_v62 = vsel %vm1283_vm10, %v2938_v39, %v1068_v40  ;;  %v1557_v15 = vpop.eup %1556 }
 0x1df   :  { %v1312_v30 = vsel %vm1300_vm2, %v1295_v6, %v1237_v28  ;;  %v1230_v20 = vsel %vm1228_vm6, %v1229_v32, %v1227_v48  ;;  %vm1247_vm7 = vcmp.eq.f32.partialorder %v3330_v8, inf  ;;  %v1250_v29 = vand.u32 2147483648, %v3330_v8 }
 0x1e0   :  { %1329 = vst.msk [vmem:[%s3528_s4 + $0x58] sm:$0xff] %vm1317_vm4, %v1312_v30  ;;  %v3590_v49 = vand.u32 2147483648, %v3061_v11  ;;  %v1311_v43 = vsel %vm1300_vm2, %v1294_v62, %v1230_v20  ;;  %v1248_v60 = vsel %vm1247_vm7, %v3330_v8, %v1246_v52  ;;  %vm1249_vm8 = vcmp.eq.f32.partialorder %v3330_v8, 0.0 }
 0x1e1   :  { %vm1048_vm9 = vcmp.eq.f32.partialorder %v3070_v23, 0.0  ;;  %1328 = vst.msk [vmem:[%s3528_s4 + $0x50] sm:$0xff] %vm1317_vm4, %v1311_v43  ;;  %v1297_v39 = vsel %vm1283_vm10, %v2956_v47, %v1071_v26  ;;  %v1251_v11 = vsel %vm1249_vm8, %v1250_v29, %v1248_v60  ;;  %v1239_v50 = vmul.f32 %v1557_v15, %v3350_v61 }
 0x1e2   :  { %v1057_v13 = vsel %vm1055_vm15, %v3590_v49, %v3251_v37  ;;  %v3591_v40 = vand.u32 2147483648, %v3070_v23  ;;  %v1314_v8 = vsel %vm1300_vm2, %v1297_v39, %v1251_v11  ;;  %vm1240_vm11 = vcmp.eq.f32.partialorder %v3350_v61, inf  ;;  %v1559_v55 = vpop.eup %1558 }
 0x1e3   :  { %v1243_v38 = vand.u32 2147483648, %v3350_v61  ;;  %v1073_v21 = vsub.f32 0.0, %v1057_v13  ;;  %1331 = vst.msk [vmem:[%s3528_s4 + $0x68] sm:$0xff] %vm1317_vm4, %v1314_v8  ;;  %v1241_v47 = vsel %vm1240_vm11, %v3350_v61, %v1239_v50  ;;  %vm1242_vm13 = vcmp.eq.f32.partialorder %v3350_v61, 0.0 }
 0x1e4   :  { %v1050_v37 = vsel %vm1048_vm9, %v3591_v40, %v3272_v51  ;;  %v1296_v23 = vsel %vm1283_vm10, %v2964_v34, %v1070_v18  ;;  %v1260_v26 = vmul.f32 %v1559_v55, %v3383_v19  ;;  %vm1261_vm14 = vcmp.eq.f32.partialorder %v3383_v19, inf }
 0x1e5   :  { %v1244_v9 = vsel %vm1242_vm13, %v1243_v38, %v1241_v47  ;;  %v1561_v51 = vpop.eup %1560  ;;  %v1072_v59 = vsub.f32 0.0, %v1050_v37  ;;  %v1264_v33 = vand.u32 2147483648, %v3383_v19  ;;  %vm1263_vm15 = vcmp.eq.f32.partialorder %v3383_v19, 0.0 }
 0x1e6   :  { %v1313_v41 = vsel %vm1300_vm2, %v1296_v23, %v1244_v9  ;;  %v1262_v0 = vsel %vm1261_vm14, %v3383_v19, %v1260_v26  ;;  %v1253_v34 = vmul.f32 %v1561_v51, %v3408_v63  ;;  %v1299_v18 = vsel %vm1283_vm10, %v3406_v22, %v1073_v21 }
 0x1e7   :  { %1330 = vst.msk [vmem:[%s3528_s4 + $0x60] sm:$0xff] %vm1317_vm4, %v1313_v41  ;;  %v1265_v61 = vsel %vm1263_vm15, %v1264_v33, %v1262_v0  ;;  %vm1254_vm0 = vcmp.eq.f32.partialorder %v3408_v63, inf  ;;  %v1257_v7 = vand.u32 2147483648, %v3408_v63  ;;  %vm1256_vm1 = vcmp.eq.f32.partialorder %v3408_v63, 0.0 }
 0x1e8   :  { %v1316_v14 = vsel %vm1300_vm2, %v1299_v18, %v1265_v61  ;;  %v1255_v2 = vsel %vm1254_vm0, %v3408_v63, %v1253_v34  ;;  %v1298_v19 = vsel %vm1283_vm10, %v1281_v31, %v1072_v59 }
 0x1e9   :  { %1333 = vst.msk [vmem:[%s3528_s4 + $0x78] sm:$0xff] %vm1317_vm4, %v1316_v14  ;;  %v1258_v57 = vsel %vm1256_vm1, %v1257_v7, %v1255_v2 }
 0x1ea   :  { %v1315_v10 = vsel %vm1300_vm2, %v1298_v19, %v1258_v57 }
 0x1eb   :  { %1332 = vst.msk [vmem:[%s3528_s4 + $0x70] sm:$0xff] %vm1317_vm4, %v1315_v10 }

</bundles_post_ra>
